<compile_context>
chip_gen: v5e
topology: v5e:2x2
jax: 0.10.0
libtpu: 0.0.40
codegen_flags: <defaults>
</compile_context>

<pallas_src>
import functools

import jax
import jax.numpy as jnp
from jax.experimental import pallas as pl
from jax.experimental.pallas import tpu as pltpu


def _round_up(x, m):
    return (x + m - 1) // m * m


def _cdiv(a, b):
    return -(-a // b)


# Minimum token count at which we insist on an even >=2-step grid so both
# v7x TensorCores get work.  Below this the whole problem is one tiny tile.
_EVEN_GRID_MIN_TOKENS = 256


def _recon_kernel(x_ref,
                  w1, b1, w2, b2, w3, b3, w4, b4, w5, b5,
                  delta_ref):
    """One row-tile of tokens through mlp + shape_decoder.

    x_ref:     (TM, ndim)      keypoint features (token-major, compute dtype)
    w*:        weight blocks (compute dtype)
    b1..b4:    biases in compute dtype (bf16 epilogue); b5 stays f32
    delta_ref: (TM, out3_pad)  recon_delta rows (lane-dense, padded cols, f32)
    """

    def dense(h, w_ref, b_ref, relu, keep_f32=False):
        # MXU matmul with f32 accumulation.  For intermediate layers the
        # accumulator is cast once to the compute dtype and the bias-add /
        # ReLU epilogue runs there (bf16 VALU on v6e/v7x).  The final layer
        # keeps the f32 accumulator for the f32 output store.
        y = jnp.dot(h, w_ref[...], preferred_element_type=jnp.float32)
        if not keep_f32:
            y = y.astype(w_ref.dtype)
        y = y + b_ref[...]
        if relu:
            y = jnp.maximum(y, 0.0)
        return y

    h = x_ref[...]
    # mlp: Conv1d(ndim, ndim, 1) -> ReLU -> Conv1d(ndim, ndim, 1)
    h = dense(h, w1, b1, relu=True)
    h = dense(h, w2, b2, relu=False)
    # shape_decoder: Conv1d(ndim,512,1) -> ReLU -> Conv1d(512,512,1) -> ReLU
    #                -> Conv1d(512, 3*pts_per_kpt, 1)   (cols padded to 128k)
    h = dense(h, w3, b3, relu=True)
    h = dense(h, w4, b4, relu=True)
    delta_ref[...] = dense(h, w5, b5, relu=False, keep_f32=True)


def prepare_params(params, pts_per_kpt, compute_dtype=jnp.bfloat16):
    """One-time preprocessing: cast weights/biases to the compute dtype and
    zero-pad the final layer's output channels to a multiple of 128 (lane
    density).  Do this once outside the per-step forward call."""
    out3 = 3 * pts_per_kpt
    out3_pad = _round_up(out3, 128)
    w5 = params["dec_w3"]
    b5 = params["dec_b3"]
    if out3_pad != out3:
        w5 = jnp.pad(w5, ((0, 0), (0, out3_pad - out3)))
        b5 = jnp.pad(b5, ((0, 0), (0, out3_pad - out3)))
    return {
        "w1": params["mlp_w1"].astype(compute_dtype),
        "b1": params["mlp_b1"].astype(compute_dtype),
        "w2": params["mlp_w2"].astype(compute_dtype),
        "b2": params["mlp_b2"].astype(compute_dtype),
        "w3": params["dec_w1"].astype(compute_dtype),
        "b3": params["dec_b1"].astype(compute_dtype),
        "w4": params["dec_w2"].astype(compute_dtype),
        "b4": params["dec_b2"].astype(compute_dtype),
        "w5": w5.astype(compute_dtype),
        "b5": b5.astype(jnp.float32),   # final bias stays f32 (f32 store)
    }


def reconstructor1_forward(kpt_3d, kpt_feature, prepped, pts_per_kpt, *,
                           tm=512):
    """Pallas implementation of Reconstructor1.forward.

    Args:
      kpt_3d:      (b, 3, kpt_num) float32
      kpt_feature: (b, ndim, kpt_num) float32
      prepped:     output of prepare_params() (compute-dtype weights)
      pts_per_kpt: number of reconstructed points per keypoint
      tm:          row tile (tokens per grid step); multiple of 8

    Returns:
      recon_model: (b, 3, kpt_num * pts_per_kpt)
      recon_delta: (b, kpt_num * pts_per_kpt, 3)
    """
    b, _, kpt_num = kpt_3d.shape
    ndim = kpt_feature.shape[1]
    n_tok = b * kpt_num
    out3 = 3 * pts_per_kpt
    out3_pad = prepped["w5"].shape[1]
    compute_dtype = prepped["w1"].dtype
    assert tm % 8 == 0, "row tile must be a multiple of the sublane count (8)"

    # --- tile / grid selection -------------------------------------------
    n_tok8 = _round_up(n_tok, 8)
    tm_eff = min(tm, n_tok8)
    steps = _cdiv(n_tok8, tm_eff)
    # v7x has 2 TensorCores: for non-trivial N keep an even step count >= 2 so
    # dimension_semantics=("parallel",) shards tiles evenly across both cores.
    # (Harmless on 1-TC v5e/v6e: at most one extra ~0.35us step of overhead.)
    if steps == 1 and n_tok8 >= _EVEN_GRID_MIN_TOKENS:
        steps = 2
    if steps > 1:
        if steps % 2:
            steps += 1
        tm_eff = _round_up(_cdiv(n_tok8, steps), 8)
    n_pad = steps * tm_eff

    # --- glue: NCW -> token-major (N, C), cast fused into the same copy ----
    # TODO(synk): for very small/overhead-bound N this transpose could be
    # folded into the kernel (XLU is idle) by taking per-batch (ndim, kpt)
    # blocks; kept in the wrapper here so row tiles stay large.
    x = (jnp.transpose(kpt_feature, (0, 2, 1))
         .reshape(n_tok, ndim)
         .astype(compute_dtype))
    if n_pad != n_tok:
        x = jnp.pad(x, ((0, n_pad - n_tok), (0, 0)))

    w1, b1 = prepped["w1"], prepped["b1"]
    w2, b2 = prepped["w2"], prepped["b2"]
    w3, b3 = prepped["w3"], prepped["b3"]
    w4, b4 = prepped["w4"], prepped["b4"]
    w5, b5 = prepped["w5"], prepped["b5"]

    def row_spec(cols):
        return pl.BlockSpec((tm_eff, cols), lambda i: (i, 0))

    def full_spec(arr):
        # Grid-invariant block (constant index_map): fetched once, no
        # per-step re-DMA.
        return pl.BlockSpec(arr.shape, lambda i: (0, 0))

    operands = (x, w1, b1, w2, b2, w3, b3, w4, b4, w5, b5)

    # --- VMEM budget: derived from actual footprint (v7x has only 64 MiB) --
    itemsize = jnp.dtype(compute_dtype).itemsize
    weight_bytes = 2 * sum(int(v.size) * v.dtype.itemsize
                           for v in prepped.values())        # double-buffered
    tile_bytes = (2 * tm_eff * ndim * itemsize                # x tile (2 bufs)
                  + 2 * tm_eff * out3_pad * 4)                # out tile (2 bufs)
    scratch_bytes = 4 * tm_eff * 512 * 4                      # live intermediates
    vmem_limit = int(min(32 << 20,
                         max(16 << 20,
                             weight_bytes + tile_bytes + scratch_bytes
                             + (4 << 20))))

    flops = 2 * n_pad * (2 * ndim * ndim + ndim * 512 + 512 * 512
                         + 512 * out3_pad)
    bytes_accessed = (sum(int(a.size) * a.dtype.itemsize for a in operands)
                      + n_pad * out3_pad * 4)

    delta_flat = pl.pallas_call(
        _recon_kernel,
        out_shape=jax.ShapeDtypeStruct((n_pad, out3_pad), jnp.float32),
        grid_spec=pltpu.PrefetchScalarGridSpec(
            num_scalar_prefetch=0,
            grid=(steps,),
            in_specs=[
                row_spec(ndim),                       # x tokens
                full_spec(w1), full_spec(b1),
                full_spec(w2), full_spec(b2),
                full_spec(w3), full_spec(b3),
                full_spec(w4), full_spec(b4),
                full_spec(w5), full_spec(b5),
            ],
            out_specs=row_spec(out3_pad),
        ),
        compiler_params=pltpu.CompilerParams(
            dimension_semantics=("parallel",),
            vmem_limit_bytes=vmem_limit,
        ),
        cost_estimate=pl.CostEstimate(
            flops=flops, transcendentals=0, bytes_accessed=bytes_accessed),
    )(*operands)

    # Glue: strip padding, reshape to PyTorch conventions, and do the
    # repeat_interleave(kpt_3d) + add here (fuses with the transpose).
    delta = delta_flat[:n_tok, :out3].reshape(b, kpt_num, pts_per_kpt, 3)
    kpt_t = jnp.transpose(kpt_3d, (0, 2, 1))          # (b, kpt_num, 3)
    model = delta + kpt_t[:, :, None, :]              # broadcast == repeat_interleave
    recon_delta = delta.reshape(b, kpt_num * pts_per_kpt, 3)
    recon_model = jnp.transpose(
        model.reshape(b, kpt_num * pts_per_kpt, 3), (0, 2, 1))
    return recon_model, recon_delta


def init_params(key, ndim, pts_per_kpt):
    """Deterministic synthetic weights. Conv1d(kernel=1) weight (O, I, 1) is
    stored transposed as (I, O) so the kernel can do row-major matmuls."""
    shapes = {
        "mlp_w1": (ndim, ndim), "mlp_b1": (1, ndim),
        "mlp_w2": (ndim, ndim), "mlp_b2": (1, ndim),
        "dec_w1": (ndim, 512), "dec_b1": (1, 512),
        "dec_w2": (512, 512), "dec_b2": (1, 512),
        "dec_w3": (512, 3 * pts_per_kpt), "dec_b3": (1, 3 * pts_per_kpt),
    }
    params = {}
    for name, shape in shapes.items():
        key, sub = jax.random.split(key)
        fan_in = shape[0] if "_w" in name else shape[1]
        scale = 1.0 / jnp.sqrt(jnp.float32(fan_in))
        params[name] = scale * jax.random.normal(sub, shape, dtype=jnp.float32)
    return params


def reference_forward(kpt_3d, kpt_feature, params, pts_per_kpt):
    """Pure-JAX f32 reference mirroring the PyTorch forward."""
    b, _, kpt_num = kpt_3d.shape
    x = jnp.transpose(kpt_feature, (0, 2, 1))           # (b, kpt_num, ndim)
    h = jnp.maximum(x @ params["mlp_w1"] + params["mlp_b1"], 0.0)
    h = h @ params["mlp_w2"] + params["mlp_b2"]
    h = jnp.maximum(h @ params["dec_w1"] + params["dec_b1"], 0.0)
    h = jnp.maximum(h @ params["dec_w2"] + params["dec_b2"], 0.0)
    delta = h @ params["dec_w3"] + params["dec_b3"]      # (b, kpt_num, 3P)
    recon_delta = delta.reshape(b, kpt_num * pts_per_kpt, 3)
    kpt_il = jnp.repeat(jnp.transpose(kpt_3d, (0, 2, 1)), pts_per_kpt, axis=1)
    recon_model = jnp.transpose(recon_delta + kpt_il, (0, 2, 1))
    return recon_model, recon_delta


if __name__ == "__main__":
    # ---------------- small, module-consistent shapes ----------------------
    b, kpt_num, ndim, pts_per_kpt = 2, 8, 32, 4

    key = jax.random.PRNGKey(0)
    k1, k2, k3 = jax.random.split(key, 3)
    kpt_3d = jax.random.normal(k1, (b, 3, kpt_num), dtype=jnp.float32)
    kpt_feature = jax.random.normal(k2, (b, ndim, kpt_num), dtype=jnp.float32)
    params = init_params(k3, ndim, pts_per_kpt)

    ref_model, ref_delta = reference_forward(kpt_3d, kpt_feature, params,
                                             pts_per_kpt)

    fwd = jax.jit(functools.partial(reconstructor1_forward,
                                    pts_per_kpt=pts_per_kpt))

    # Exact-f32 path (tight tolerance).
    pp_f32 = prepare_params(params, pts_per_kpt, compute_dtype=jnp.float32)
    m32, d32 = fwd(kpt_3d, kpt_feature, pp_f32)
    jax.block_until_ready((m32, d32))
    assert m32.shape == (b, 3, kpt_num * pts_per_kpt)
    assert d32.shape == (b, kpt_num * pts_per_kpt, 3)
    assert jnp.allclose(m32, ref_model, atol=1e-4, rtol=1e-4)
    assert jnp.allclose(d32, ref_delta, atol=1e-4, rtol=1e-4)

    # bf16 fast path (MXU-native on v5e/v6e/v7x; f32 accumulation) — looser tol.
    pp_bf16 = prepare_params(params, pts_per_kpt, compute_dtype=jnp.bfloat16)
    mbf, dbf = fwd(kpt_3d, kpt_feature, pp_bf16)
    jax.block_until_ready((mbf, dbf))
    assert mbf.shape == (b, 3, kpt_num * pts_per_kpt)
    assert dbf.shape == (b, kpt_num * pts_per_kpt, 3)
    assert jnp.allclose(mbf, ref_model, atol=1e-1, rtol=5e-2)
    assert jnp.allclose(dbf, ref_delta, atol=1e-1, rtol=5e-2)

    # ------------- multi-step (even >= 2) grid path -------------------------
    # Exercises the two-TensorCore-friendly tiling (n_tok >= 256 -> 2 steps).
    b2, kn2, nd2, pk2 = 4, 96, 64, 12
    j1, j2, j3 = jax.random.split(jax.random.PRNGKey(1), 3)
    kpt_3d2 = jax.random.normal(j1, (b2, 3, kn2), dtype=jnp.float32)
    kpt_feat2 = jax.random.normal(j2, (b2, nd2, kn2), dtype=jnp.float32)
    params2 = init_params(j3, nd2, pk2)
    ref_m2, ref_d2 = reference_forward(kpt_3d2, kpt_feat2, params2, pk2)

    fwd2 = jax.jit(functools.partial(reconstructor1_forward, pts_per_kpt=pk2))
    pp2 = prepare_params(params2, pk2, compute_dtype=jnp.bfloat16)
    m2, d2 = fwd2(kpt_3d2, kpt_feat2, pp2)
    jax.block_until_ready((m2, d2))
    assert m2.shape == (b2, 3, kn2 * pk2)
    assert d2.shape == (b2, kn2 * pk2, 3)
    assert jnp.allclose(m2, ref_m2, atol=1e-1, rtol=5e-2)
    assert jnp.allclose(d2, ref_d2, atol=1e-1, rtol=5e-2)

    print("KERNEL_OK")
</pallas_src>

<mosaic_0001>
module attributes {stable_mosaic.version = 11 : i64} {
  func.func @_recon_kernel(%arg0: i32, %arg1: memref<16x32xf32, #tpu.memory_space<vmem>>, %arg2: memref<32x32xf32, #tpu.memory_space<vmem>>, %arg3: memref<1x32xf32, #tpu.memory_space<vmem>>, %arg4: memref<32x32xf32, #tpu.memory_space<vmem>>, %arg5: memref<1x32xf32, #tpu.memory_space<vmem>>, %arg6: memref<32x512xf32, #tpu.memory_space<vmem>>, %arg7: memref<1x512xf32, #tpu.memory_space<vmem>>, %arg8: memref<512x512xf32, #tpu.memory_space<vmem>>, %arg9: memref<1x512xf32, #tpu.memory_space<vmem>>, %arg10: memref<512x128xf32, #tpu.memory_space<vmem>>, %arg11: memref<1x128xf32, #tpu.memory_space<vmem>>, %arg12: memref<16x128xf32, #tpu.memory_space<vmem>>) attributes {dimension_semantics = [#tpu.dimension_semantics<parallel>], iteration_bounds = array<i64: 1>, scalar_prefetch = 0 : i64, scratch_operands = 0 : i64, tpu.core_type = #tpu.core_type<tc>, window_params = [{transform_indices = @transform_0, window_bounds = array<i64: 16, 32>}, {pipeline_mode = #tpu.pipeline_mode<synchronous>, transform_indices = @transform_1, window_bounds = array<i64: 32, 32>}, {pipeline_mode = #tpu.pipeline_mode<synchronous>, transform_indices = @transform_2, window_bounds = array<i64: 1, 32>}, {pipeline_mode = #tpu.pipeline_mode<synchronous>, transform_indices = @transform_3, window_bounds = array<i64: 32, 32>}, {pipeline_mode = #tpu.pipeline_mode<synchronous>, transform_indices = @transform_4, window_bounds = array<i64: 1, 32>}, {pipeline_mode = #tpu.pipeline_mode<synchronous>, transform_indices = @transform_5, window_bounds = array<i64: 32, 512>}, {pipeline_mode = #tpu.pipeline_mode<synchronous>, transform_indices = @transform_6, window_bounds = array<i64: 1, 512>}, {pipeline_mode = #tpu.pipeline_mode<synchronous>, transform_indices = @transform_7, window_bounds = array<i64: 512, 512>}, {pipeline_mode = #tpu.pipeline_mode<synchronous>, transform_indices = @transform_8, window_bounds = array<i64: 1, 512>}, {pipeline_mode = #tpu.pipeline_mode<synchronous>, transform_indices = @transform_9, window_bounds = array<i64: 512, 128>}, {pipeline_mode = #tpu.pipeline_mode<synchronous>, transform_indices = @transform_10, window_bounds = array<i64: 1, 128>}, {transform_indices = @transform_11, window_bounds = array<i64: 16, 128>}]} {
    %c0 = arith.constant 0 : index
    %c0_0 = arith.constant 0 : index
    %0 = vector.load %arg1[%c0, %c0_0] : memref<16x32xf32, #tpu.memory_space<vmem>>, vector<16x32xf32>
    %c0_1 = arith.constant 0 : index
    %c0_2 = arith.constant 0 : index
    %1 = vector.load %arg2[%c0_1, %c0_2] : memref<32x32xf32, #tpu.memory_space<vmem>>, vector<32x32xf32>
    %cst = arith.constant dense<0.000000e+00> : vector<16x32xf32>
    %2 = tpu.matmul %0, %1, %cst {dimension_numbers = #tpu.dot_dimension_numbers<[1], [0], [0], [1], [0, 0, 1, 1], [], []>} : vector<16x32xf32>, vector<32x32xf32>, vector<16x32xf32> -> vector<16x32xf32>
    %c0_3 = arith.constant 0 : index
    %c0_4 = arith.constant 0 : index
    %3 = vector.load %arg3[%c0_3, %c0_4] : memref<1x32xf32, #tpu.memory_space<vmem>>, vector<1x32xf32>
    %4 = vector.broadcast %3 : vector<1x32xf32> to vector<16x32xf32>
    %5 = arith.addf %2, %4 : vector<16x32xf32>
    %cst_5 = arith.constant 0.000000e+00 : f32
    %6 = vector.broadcast %cst_5 : f32 to vector<16x32xf32>
    %7 = arith.maximumf %5, %6 : vector<16x32xf32>
    %c0_6 = arith.constant 0 : index
    %c0_7 = arith.constant 0 : index
    %8 = vector.load %arg4[%c0_6, %c0_7] : memref<32x32xf32, #tpu.memory_space<vmem>>, vector<32x32xf32>
    %cst_8 = arith.constant dense<0.000000e+00> : vector<16x32xf32>
    %9 = tpu.matmul %7, %8, %cst_8 {dimension_numbers = #tpu.dot_dimension_numbers<[1], [0], [0], [1], [0, 0, 1, 1], [], []>} : vector<16x32xf32>, vector<32x32xf32>, vector<16x32xf32> -> vector<16x32xf32>
    %c0_9 = arith.constant 0 : index
    %c0_10 = arith.constant 0 : index
    %10 = vector.load %arg5[%c0_9, %c0_10] : memref<1x32xf32, #tpu.memory_space<vmem>>, vector<1x32xf32>
    %11 = vector.broadcast %10 : vector<1x32xf32> to vector<16x32xf32>
    %12 = arith.addf %9, %11 : vector<16x32xf32>
    %c0_11 = arith.constant 0 : index
    %c0_12 = arith.constant 0 : index
    %13 = vector.load %arg6[%c0_11, %c0_12] : memref<32x512xf32, #tpu.memory_space<vmem>>, vector<32x512xf32>
    %cst_13 = arith.constant dense<0.000000e+00> : vector<16x512xf32>
    %14 = tpu.matmul %12, %13, %cst_13 {dimension_numbers = #tpu.dot_dimension_numbers<[1], [0], [0], [1], [0, 0, 1, 1], [], []>} : vector<16x32xf32>, vector<32x512xf32>, vector<16x512xf32> -> vector<16x512xf32>
    %c0_14 = arith.constant 0 : index
    %c0_15 = arith.constant 0 : index
    %15 = vector.load %arg7[%c0_14, %c0_15] : memref<1x512xf32, #tpu.memory_space<vmem>>, vector<1x512xf32>
    %16 = vector.broadcast %15 : vector<1x512xf32> to vector<16x512xf32>
    %17 = arith.addf %14, %16 : vector<16x512xf32>
    %cst_16 = arith.constant 0.000000e+00 : f32
    %18 = vector.broadcast %cst_16 : f32 to vector<16x512xf32>
    %19 = arith.maximumf %17, %18 : vector<16x512xf32>
    %c0_17 = arith.constant 0 : index
    %c0_18 = arith.constant 0 : index
    %20 = vector.load %arg8[%c0_17, %c0_18] : memref<512x512xf32, #tpu.memory_space<vmem>>, vector<512x512xf32>
    %cst_19 = arith.constant dense<0.000000e+00> : vector<16x512xf32>
    %21 = tpu.matmul %19, %20, %cst_19 {dimension_numbers = #tpu.dot_dimension_numbers<[1], [0], [0], [1], [0, 0, 1, 1], [], []>} : vector<16x512xf32>, vector<512x512xf32>, vector<16x512xf32> -> vector<16x512xf32>
    %c0_20 = arith.constant 0 : index
    %c0_21 = arith.constant 0 : index
    %22 = vector.load %arg9[%c0_20, %c0_21] : memref<1x512xf32, #tpu.memory_space<vmem>>, vector<1x512xf32>
    %23 = vector.broadcast %22 : vector<1x512xf32> to vector<16x512xf32>
    %24 = arith.addf %21, %23 : vector<16x512xf32>
    %cst_22 = arith.constant 0.000000e+00 : f32
    %25 = vector.broadcast %cst_22 : f32 to vector<16x512xf32>
    %26 = arith.maximumf %24, %25 : vector<16x512xf32>
    %c0_23 = arith.constant 0 : index
    %c0_24 = arith.constant 0 : index
    %27 = vector.load %arg10[%c0_23, %c0_24] : memref<512x128xf32, #tpu.memory_space<vmem>>, vector<512x128xf32>
    %cst_25 = arith.constant dense<0.000000e+00> : vector<16x128xf32>
    %28 = tpu.matmul %26, %27, %cst_25 {dimension_numbers = #tpu.dot_dimension_numbers<[1], [0], [0], [1], [0, 0, 1, 1], [], []>} : vector<16x512xf32>, vector<512x128xf32>, vector<16x128xf32> -> vector<16x128xf32>
    %c0_26 = arith.constant 0 : index
    %c0_27 = arith.constant 0 : index
    %29 = vector.load %arg11[%c0_26, %c0_27] : memref<1x128xf32, #tpu.memory_space<vmem>>, vector<1x128xf32>
    %30 = vector.broadcast %29 : vector<1x128xf32> to vector<16x128xf32>
    %31 = arith.addf %28, %30 : vector<16x128xf32>
    %c0_28 = arith.constant 0 : index
    %c0_29 = arith.constant 0 : index
    %32 = vector.load %arg12[%c0_28, %c0_29] : memref<16x128xf32, #tpu.memory_space<vmem>>, vector<16x128xf32>
    tpu.vector_store %arg12[%c0_28, %c0_29], %31 {strides = array<i32>} : memref<16x128xf32, #tpu.memory_space<vmem>>, vector<16x128xf32>,
    return
  }
  func.func @transform_0(%arg0: i32) -> (i32, i32) {
    %c0_i32 = arith.constant 0 : i32
    %c0_i32_0 = arith.constant 0 : i32
    return %arg0, %c0_i32 : i32, i32
  }
  func.func @transform_1(%arg0: i32) -> (i32, i32) {
    %c0_i32 = arith.constant 0 : i32
    %c0_i32_0 = arith.constant 0 : i32
    %c0_i32_1 = arith.constant 0 : i32
    return %c0_i32, %c0_i32_0 : i32, i32
  }
  func.func @transform_2(%arg0: i32) -> (i32, i32) {
    %c0_i32 = arith.constant 0 : i32
    %c0_i32_0 = arith.constant 0 : i32
    %c0_i32_1 = arith.constant 0 : i32
    return %c0_i32, %c0_i32_0 : i32, i32
  }
  func.func @transform_3(%arg0: i32) -> (i32, i32) {
    %c0_i32 = arith.constant 0 : i32
    %c0_i32_0 = arith.constant 0 : i32
    %c0_i32_1 = arith.constant 0 : i32
    return %c0_i32, %c0_i32_0 : i32, i32
  }
  func.func @transform_4(%arg0: i32) -> (i32, i32) {
    %c0_i32 = arith.constant 0 : i32
    %c0_i32_0 = arith.constant 0 : i32
    %c0_i32_1 = arith.constant 0 : i32
    return %c0_i32, %c0_i32_0 : i32, i32
  }
  func.func @transform_5(%arg0: i32) -> (i32, i32) {
    %c0_i32 = arith.constant 0 : i32
    %c0_i32_0 = arith.constant 0 : i32
    %c0_i32_1 = arith.constant 0 : i32
    return %c0_i32, %c0_i32_0 : i32, i32
  }
  func.func @transform_6(%arg0: i32) -> (i32, i32) {
    %c0_i32 = arith.constant 0 : i32
    %c0_i32_0 = arith.constant 0 : i32
    %c0_i32_1 = arith.constant 0 : i32
    return %c0_i32, %c0_i32_0 : i32, i32
  }
  func.func @transform_7(%arg0: i32) -> (i32, i32) {
    %c0_i32 = arith.constant 0 : i32
    %c0_i32_0 = arith.constant 0 : i32
    %c0_i32_1 = arith.constant 0 : i32
    return %c0_i32, %c0_i32_0 : i32, i32
  }
  func.func @transform_8(%arg0: i32) -> (i32, i32) {
    %c0_i32 = arith.constant 0 : i32
    %c0_i32_0 = arith.constant 0 : i32
    %c0_i32_1 = arith.constant 0 : i32
    return %c0_i32, %c0_i32_0 : i32, i32
  }
  func.func @transform_9(%arg0: i32) -> (i32, i32) {
    %c0_i32 = arith.constant 0 : i32
    %c0_i32_0 = arith.constant 0 : i32
    %c0_i32_1 = arith.constant 0 : i32
    return %c0_i32, %c0_i32_0 : i32, i32
  }
  func.func @transform_10(%arg0: i32) -> (i32, i32) {
    %c0_i32 = arith.constant 0 : i32
    %c0_i32_0 = arith.constant 0 : i32
    %c0_i32_1 = arith.constant 0 : i32
    return %c0_i32, %c0_i32_0 : i32, i32
  }
  func.func @transform_11(%arg0: i32) -> (i32, i32) {
    %c0_i32 = arith.constant 0 : i32
    %c0_i32_0 = arith.constant 0 : i32
    return %arg0, %c0_i32 : i32, i32
  }
}

</mosaic_0001>

<bundles_post_ra>
// kernel: reconstructor1_forward.1
= control target key start
LH: loop header
LB: loop body
LE: loop exit
PB: predicated region body
PF: predicated region fallthrough
CT: control target
= control target key end

     0   :  { %16 = vsyncpa [#allocation3], 0  ;;  %s1496_s0 = inlined_call_operand.vmem [shape: f32[16,32], index: 0, kind: input, shape index: {}]   ;;  %s1497_s1 = inlined_call_operand.hbm [shape: f32[32,32], index: 1, kind: input, shape index: {}]   ;;  %s1498_s2 = inlined_call_operand.vmem [shape: f32[1,32], index: 2, kind: input, shape index: {}]   ;;  %s1499_s3 = inlined_call_operand.hbm [shape: f32[32,32], index: 3, kind: input, shape index: {}]   ;;  %s1500_s4 = inlined_call_operand.vmem [shape: f32[1,32], index: 4, kind: input, shape index: {}]   ;;  %s1501_s5 = inlined_call_operand.hbm [shape: f32[32,512], index: 5, kind: input, shape index: {}]   ;;  %s1502_s6 = inlined_call_operand.vmem [shape: f32[1,512], index: 6, kind: input, shape index: {}]   ;;  %s1503_s7 = inlined_call_operand.hbm [shape: f32[512,512], index: 7, kind: input, shape index: {}]   ;;  %s1504_s8 = inlined_call_operand.vmem [shape: f32[1,512], index: 8, kind: input, shape index: {}]   ;;  %s1505_s9 = inlined_call_operand.hbm [shape: f32[512,128], index: 9, kind: input, shape index: {}]   ;;  %s1506_s10 = inlined_call_operand.vmem [shape: f32[1,128], index: 10, kind: input, shape index: {}]   ;;  %s1507_s11 = inlined_call_operand.vmem [shape: f32[16,128], index: 11, kind: output, shape index: {}]  }
   0x1   :  { %17 = vsyncpa [#allocation5], 0 }
   0x2   :  { %18 = vsyncpa [#allocation8], 0  ;;  %s40_s19 = sshll.u32 %s1499_s3, 4  ;;  %s1296_s20 = smov [#allocation4]   ;;  %s41_s19 = int_to_ptr.hbm [resolvable:$true] %s40_s19 }
   0x3   :  { %s42_s21 = sshll.u32 %s1296_s20, 4  ;;  %s1297_s22 = smov 128   ;;  %s43_s21 = int_to_ptr.vmem [resolvable:$true] %s42_s21 }
   0x4   :  { %s1298_s23 = smov 8   ;;  %s70_s26 = sshll.u32 %s1503_s7, 4  ;;  %s71_s26 = int_to_ptr.hbm [resolvable:$true] %s70_s26 }
   0x5   :  { %48 = dma.hbm_to_vmem [thread:$0]  %s41_s19, 512, %s43_s21, [#allocation5], %s1297_s22, %s1297_s22, %s1298_s23  }
   0x6   :  { %s1299_s27 = smov [#allocation7]   ;;  %s25_s3 = sshll.u32 %s1497_s1, 4  ;;  %s26_s3 = int_to_ptr.hbm [resolvable:$true] %s25_s3 }
   0x7   :  { %s72_s28 = sshll.u32 %s1299_s27, 4  ;;  %s1300_s12 = smov 512   ;;  %s73_s28 = int_to_ptr.vmem [resolvable:$true] %s72_s28 }
   0x8   :  { %s1301_s13 = smov 32   ;;  %s55_s16 = sshll.u32 %s1501_s5, 4  ;;  %s56_s16 = int_to_ptr.hbm [resolvable:$true] %s55_s16 }
   0x9   :  { %78 = dma.hbm_to_vmem [thread:$0]  %s71_s26, 32768, %s73_s28, [#allocation8], %s1300_s12, %s1300_s12, %s1301_s13  }
   0xa   :  { %s1302_s17 = smov [#allocation2]   ;;  %s1303_s7 = smov [#allocation6]  }
   0xb   :  { %s27_s18 = sshll.u32 %s1302_s17, 4  ;;  %s57_s19 = sshll.u32 %s1303_s7, 4  ;;  %s28_s18 = int_to_ptr.vmem [resolvable:$true] %s27_s18  ;;  %s58_s19 = int_to_ptr.vmem [resolvable:$true] %s57_s19 }
   0xc   :  { %33 = dma.hbm_to_vmem [thread:$0]  %s26_s3, 512, %s28_s18, [#allocation3], %s1297_s22, %s1297_s22, %s1298_s23  }
   0xd   :  { %s85_s21 = sshll.u32 %s1505_s9, 4  ;;  %s1304_s24 = smov [#allocation9]   ;;  %s86_s21 = int_to_ptr.hbm [resolvable:$true] %s85_s21 }
   0xe   :  { %63 = dma.hbm_to_vmem [thread:$0]  %s56_s16, 2048, %s58_s19, [#allocation5], %s1300_s12, %s1300_s12, %s1301_s13  }
   0xf   :  { %s87_s25 = sshll.u32 %s1304_s24, 4  ;;  %s88_s25 = int_to_ptr.vmem [resolvable:$true] %s87_s25 }
  0x10   :  { %93 = dma.hbm_to_vmem [thread:$0]  %s86_s21, 8192, %s88_s25, [#allocation8], %s1297_s22, %s1297_s22, %s1298_s23  }
  0x11   :  { %1290 = dma.done.wait [#allocation3], 512  }
  0x12   :  { %1291 = vsyncadd [#allocation3], 4294966784 }
  0x13   :  { %1292 = dma.done.wait [#allocation5], 2560  }
  0x14   :  { %1293 = vsyncadd [#allocation5], 4294964736 }
  0x15   :  { %1294 = dma.done.wait [#allocation8], 40960  }
  0x16   :  { %1295 = vsyncadd [#allocation8], 4294926336  ;;  %v121_v0 = vld [vmem:[#allocation2 + $0x18] sm:$0xff]  ;;  %v120_v1 = vld [vmem:[#allocation2 + $0x10] sm:$0xff]  ;;  %vm126_vm0 = vcmask 261120  }
  0x17   :  { %145 = vmatpush.msra.mxu0 %v121_v0  ;;  %1150 = vmatpush.msra.mxu2 %v121_v0  ;;  %v119_v2 = vld [vmem:[#allocation2 + $0x8] sm:$0xff]  ;;  %v161_v3 = vld [vmem:[#allocation4 + $0x18] sm:$0xff]  ;;  %v118_v4 = vld [vmem:[#allocation2] sm:$0xff] }
  0x18   :  { %184 = vmatpush.msra.mxu1 %v161_v3  ;;  %1154 = vmatpush.msra.mxu3 %v161_v3  ;;  %v116_v5 = vld [vmem:[%s1496_s0] sm:$0xff]  ;;  %v117_v6 = vld [vmem:[%s1496_s0 + $0x8] sm:$0xff]  ;;  %v160_v7 = vld [vmem:[#allocation4 + $0x10] sm:$0xff] }
  0x19   :  { %146 = vmatpush.msra.mxu0 %v120_v1  ;;  %1151 = vmatpush.msra.mxu2 %v120_v1  ;;  %v159_v8 = vld [vmem:[#allocation4 + $0x8] sm:$0xff]  ;;  %v158_v9 = vld [vmem:[#allocation4] sm:$0xff]  ;;  %v209_v12 = vld [vmem:[#allocation6 + $0x70] sm:$0xff] }
  0x1a   :  { %185 = vmatpush.msra.mxu1 %v160_v7  ;;  %1155 = vmatpush.msra.mxu3 %v160_v7  ;;  %v207_v10 = vld [vmem:[#allocation6 + $0x60] sm:$0xff]  ;;  %v208_v11 = vld [vmem:[#allocation6 + $0x68] sm:$0xff]  ;;  %v210_v13 = vld [vmem:[#allocation6 + $0x78] sm:$0xff] }
  0x1b   :  { %147 = vmatpush.msra.mxu0 %v119_v2  ;;  %1152 = vmatpush.msra.mxu2 %v119_v2  ;;  %v203_v14 = vld [vmem:[#allocation6 + $0x40] sm:$0xff]  ;;  %v204_v15 = vld [vmem:[#allocation6 + $0x48] sm:$0xff]  ;;  %v205_v16 = vld [vmem:[#allocation6 + $0x50] sm:$0xff] }
  0x1c   :  { %186 = vmatpush.msra.mxu1 %v159_v8  ;;  %1156 = vmatpush.msra.mxu3 %v159_v8  ;;  %v206_v17 = vld [vmem:[#allocation6 + $0x58] sm:$0xff]  ;;  %v1167_v18 = vld [vmem:[%s1498_s2] ss:$0 sm:$0xff]  ;;  %v200_v26 = vld [vmem:[#allocation6 + $0x28] sm:$0xff] }
  0x1d   :  { %148 = vmatpush.msra.mxu0 %v118_v4  ;;  %1153 = vmatpush.msra.mxu2 %v118_v4  ;;  %v199_v25 = vld [vmem:[#allocation6 + $0x20] sm:$0xff]  ;;  %v201_v27 = vld [vmem:[#allocation6 + $0x30] sm:$0xff]  ;;  %v202_v28 = vld [vmem:[#allocation6 + $0x38] sm:$0xff] }
  0x1e   :  { %1138 = vmatmul.msk.f32.vlgmr.msra.gmra.mxu0 %vm126_vm0, %v116_v5  ;;  %1139 = vmatmul.msk.f32.vlgmr.msra.gmra.mxu2 %vm126_vm0, %v117_v6  ;;  %v195_v29 = vld [vmem:[#allocation6] sm:$0xff]  ;;  %v196_v30 = vld [vmem:[#allocation6 + $0x8] sm:$0xff]  ;;  %v197_v31 = vld [vmem:[#allocation6 + $0x10] sm:$0xff] }
  0x1f   :  { %187 = vmatpush.msra.mxu1 %v158_v9  ;;  %1157 = vmatpush.msra.mxu3 %v158_v9  ;;  %v198_v32 = vld [vmem:[#allocation6 + $0x18] sm:$0xff]  ;;  %v515_v33 = vld [vmem:[#allocation7 + $0x5e0] sm:$0xff] }
  0x20   :  { %239 = vmatpush.msrb.mxu2 %v207_v10  ;;  %285 = vmatpush.msrb.mxu0 %v209_v12  ;;  %v579_v34 = vld [vmem:[#allocation7 + $0x7e0] sm:$0xff] }
  0x21   :  { %262 = vmatpush.msrb.mxu3 %v208_v11  ;;  %308 = vmatpush.msrb.mxu1 %v210_v13  ;;  %v511_v35 = vld [vmem:[#allocation7 + $0x5c0] sm:$0xff] }
  0x22   :  { %240 = vmatpush.msrb.mxu2 %v203_v14  ;;  %286 = vmatpush.msrb.mxu0 %v205_v16  ;;  %v575_v36 = vld [vmem:[#allocation7 + $0x7c0] sm:$0xff] }
  0x23   :  { %263 = vmatpush.msrb.mxu3 %v204_v15  ;;  %309 = vmatpush.msrb.mxu1 %v206_v17  ;;  %v507_v37 = vld [vmem:[#allocation7 + $0x5a0] sm:$0xff] }
  0x24   :  { %241 = vmatpush.msrb.mxu2 %v199_v25  ;;  %287 = vmatpush.msrb.mxu0 %v201_v27  ;;  %v571_v38 = vld [vmem:[#allocation7 + $0x7a0] sm:$0xff] }
  0x25   :  { %264 = vmatpush.msrb.mxu3 %v200_v26  ;;  %310 = vmatpush.msrb.mxu1 %v202_v28  ;;  %v387_v39 = vld [vmem:[#allocation7 + $0x1e0] sm:$0xff] }
  0x26   :  { %242 = vmatpush.msrb.mxu2 %v195_v29  ;;  %288 = vmatpush.msrb.mxu0 %v197_v31  ;;  %v451_v40 = vld [vmem:[#allocation7 + $0x3e0] sm:$0xff] }
  0x27   :  { %265 = vmatpush.msrb.mxu3 %v196_v30  ;;  %311 = vmatpush.msrb.mxu1 %v198_v32  ;;  %v383_v41 = vld [vmem:[#allocation7 + $0x1c0] sm:$0xff] }
  0x28   :  { %639 = vmatpush.msra.mxu0 %v515_v33  ;;  %v447_v42 = vld [vmem:[#allocation7 + $0x3c0] sm:$0xff]  ;;  %593 = vmatpush.msra.mxu2 %v387_v39  ;;  %v576_v39 = vld [vmem:[#allocation7 + $0x7c8] sm:$0xff] }
  0x29   :  { %v503_v43 = vld [vmem:[#allocation7 + $0x580] sm:$0xff] }
  0x2a   :  { %640 = vmatpush.msra.mxu0 %v511_v35  ;;  %v567_v44 = vld [vmem:[#allocation7 + $0x780] sm:$0xff]  ;;  %594 = vmatpush.msra.mxu2 %v383_v41  ;;  %v580_v35 = vld [vmem:[#allocation7 + $0x7e8] sm:$0xff] }
  0x2b   :  { %v379_v45 = vld [vmem:[#allocation7 + $0x1a0] sm:$0xff] }
  0x2c   :  { %641 = vmatpush.msra.mxu0 %v507_v37  ;;  %v443_v46 = vld [vmem:[#allocation7 + $0x3a0] sm:$0xff]  ;;  %595 = vmatpush.msra.mxu2 %v379_v45  ;;  %v452_v45 = vld [vmem:[#allocation7 + $0x3e8] sm:$0xff] }
  0x2d   :  { %v499_v47 = vld [vmem:[#allocation7 + $0x560] sm:$0xff] }
  0x2e   :  { %v563_v48 = vld [vmem:[#allocation7 + $0x760] sm:$0xff]  ;;  %642 = vmatpush.msra.mxu0 %v503_v43  ;;  %v572_v43 = vld [vmem:[#allocation7 + $0x7a8] sm:$0xff] }
  0x2f   :  { %v375_v49 = vld [vmem:[#allocation7 + $0x180] sm:$0xff] }
  0x30   :  { %v439_v50 = vld [vmem:[#allocation7 + $0x380] sm:$0xff]  ;;  %643 = vmatpush.msra.mxu0 %v499_v47  ;;  %596 = vmatpush.msra.mxu2 %v375_v49  ;;  %v568_v47 = vld [vmem:[#allocation7 + $0x788] sm:$0xff] }
  0x31   :  { %v495_v51 = vld [vmem:[#allocation7 + $0x540] sm:$0xff]  ;;  %v448_v49 = vld [vmem:[#allocation7 + $0x3c8] sm:$0xff] }
  0x32   :  { %v559_v52 = vld [vmem:[#allocation7 + $0x740] sm:$0xff]  ;;  %644 = vmatpush.msra.mxu0 %v495_v51  ;;  %v564_v51 = vld [vmem:[#allocation7 + $0x768] sm:$0xff] }
  0x33   :  { %v371_v53 = vld [vmem:[#allocation7 + $0x160] sm:$0xff] }
  0x34   :  { %v435_v54 = vld [vmem:[#allocation7 + $0x360] sm:$0xff]  ;;  %597 = vmatpush.msra.mxu2 %v371_v53  ;;  %v444_v53 = vld [vmem:[#allocation7 + $0x3a8] sm:$0xff] }
  0x35   :  { %v491_v55 = vld [vmem:[#allocation7 + $0x520] sm:$0xff] }
  0x36   :  { %v555_v56 = vld [vmem:[#allocation7 + $0x720] sm:$0xff]  ;;  %645 = vmatpush.msra.mxu0 %v491_v55  ;;  %v560_v55 = vld [vmem:[#allocation7 + $0x748] sm:$0xff] }
  0x37   :  { %v367_v57 = vld [vmem:[#allocation7 + $0x140] sm:$0xff] }
  0x38   :  { %v431_v58 = vld [vmem:[#allocation7 + $0x340] sm:$0xff]  ;;  %598 = vmatpush.msra.mxu2 %v367_v57  ;;  %v440_v57 = vld [vmem:[#allocation7 + $0x388] sm:$0xff] }
  0x39   :  { %v487_v59 = vld [vmem:[#allocation7 + $0x500] sm:$0xff] }
  0x3a   :  { %v551_v60 = vld [vmem:[#allocation7 + $0x700] sm:$0xff]  ;;  %646 = vmatpush.msra.mxu0 %v487_v59  ;;  %v556_v59 = vld [vmem:[#allocation7 + $0x728] sm:$0xff] }
  0x3b   :  { %v1168_v61 = vld [vmem:[%s1500_s4] ss:$0 sm:$0xff] }
  0x3c   :  { %v363_v62 = vld [vmem:[#allocation7 + $0x120] sm:$0xff] }
  0x3d   :  { %v427_v63 = vld [vmem:[#allocation7 + $0x320] sm:$0xff]  ;;  %599 = vmatpush.msra.mxu2 %v363_v62  ;;  %v488_v62 = vld [vmem:[#allocation7 + $0x508] sm:$0xff] }
  0x3e   :  { %v483_v0 = vld [vmem:[#allocation7 + $0x4e0] sm:$0xff] }
  0x3f   :  { %v547_v1 = vld [vmem:[#allocation7 + $0x6e0] sm:$0xff]  ;;  %647 = vmatpush.msra.mxu0 %v483_v0  ;;  %v368_v0 = vld [vmem:[#allocation7 + $0x148] sm:$0xff] }
  0x40   :  { %v359_v2 = vld [vmem:[#allocation7 + $0x100] sm:$0xff] }
  0x41   :  { %v423_v3 = vld [vmem:[#allocation7 + $0x300] sm:$0xff]  ;;  %600 = vmatpush.msra.mxu2 %v359_v2  ;;  %v484_v2 = vld [vmem:[#allocation7 + $0x4e8] sm:$0xff] }
  0x42   :  { %v479_v6 = vld [vmem:[#allocation7 + $0x4c0] sm:$0xff] }
  0x43   :  { %v543_v7 = vld [vmem:[#allocation7 + $0x6c0] sm:$0xff]  ;;  %648 = vmatpush.msra.mxu0 %v479_v6  ;;  %v480_v6 = vld [vmem:[#allocation7 + $0x4c8] sm:$0xff] }
  0x44   :  { %v355_v8 = vld [vmem:[#allocation7 + $0xe0] sm:$0xff] }
  0x45   :  { %v419_v9 = vld [vmem:[#allocation7 + $0x2e0] sm:$0xff]  ;;  %601 = vmatpush.msra.mxu2 %v355_v8  ;;  %v360_v8 = vld [vmem:[#allocation7 + $0x108] sm:$0xff] }
  0x46   :  { %v475_v10 = vld [vmem:[#allocation7 + $0x4a0] sm:$0xff] }
  0x47   :  { %v539_v11 = vld [vmem:[#allocation7 + $0x6a0] sm:$0xff]  ;;  %649 = vmatpush.msra.mxu0 %v475_v10  ;;  %v476_v10 = vld [vmem:[#allocation7 + $0x4a8] sm:$0xff] }
  0x48   :  { %v351_v12 = vld [vmem:[#allocation7 + $0xc0] sm:$0xff] }
  0x49   :  { %v415_v13 = vld [vmem:[#allocation7 + $0x2c0] sm:$0xff]  ;;  %602 = vmatpush.msra.mxu2 %v351_v12  ;;  %v356_v12 = vld [vmem:[#allocation7 + $0xe8] sm:$0xff] }
  0x4a   :  { %v471_v14 = vld [vmem:[#allocation7 + $0x480] sm:$0xff] }
  0x4b   :  { %v535_v15 = vld [vmem:[#allocation7 + $0x680] sm:$0xff]  ;;  %650 = vmatpush.msra.mxu0 %v471_v14  ;;  %v472_v14 = vld [vmem:[#allocation7 + $0x488] sm:$0xff] }
  0x4c   :  { %v347_v16 = vld [vmem:[#allocation7 + $0xa0] sm:$0xff] }
  0x4d   :  { %v411_v17 = vld [vmem:[#allocation7 + $0x2a0] sm:$0xff]  ;;  %603 = vmatpush.msra.mxu2 %v347_v16  ;;  %v352_v16 = vld [vmem:[#allocation7 + $0xc8] sm:$0xff] }
  0x4e   :  { %v403_v25 = vld [vmem:[#allocation7 + $0x260] sm:$0xff] }
  0x4f   :  { %v459_v28 = vld [vmem:[#allocation7 + $0x420] sm:$0xff] }
  0x50   :  { %v523_v29 = vld [vmem:[#allocation7 + $0x620] sm:$0xff] }
  0x51   :  { %v335_v30 = vld [vmem:[#allocation7 + $0x40] sm:$0xff] }
  0x52   :  { %v399_v31 = vld [vmem:[#allocation7 + $0x240] sm:$0xff] }
  0x53   :  { %v455_v32 = vld [vmem:[#allocation7 + $0x400] sm:$0xff] }
  0x54   :  { %v519_v33 = vld [vmem:[#allocation7 + $0x600] sm:$0xff] }
  0x55   :  { %v395_v37 = vld [vmem:[#allocation7 + $0x220] sm:$0xff] }
  0x56   :  { %v391_v41 = vld [vmem:[#allocation7 + $0x200] sm:$0xff] }
  0x9b   :  { %v150_v19 = vpop.f32.mrf.mxu0 }
  0x9c   :  { %v151_v20 = vadd.f32 %v1167_v18, %v150_v19  ;;  %v531_v19 = vld [vmem:[#allocation7 + $0x660] sm:$0xff] }
  0x9e   :  { %v156_v21 = vmax.f32 %v151_v20, 0.0  ;;  %v343_v20 = vld [vmem:[#allocation7 + $0x80] sm:$0xff] }
  0x9f   :  { %604 = vmatpush.msra.mxu2 %v343_v20  ;;  %v348_v20 = vld [vmem:[#allocation7 + $0xa8] sm:$0xff] }
  0xa0   :  { %1140 = vmatmul.msk.f32.vlgmr.msra.gmra.mxu1 %vm126_vm0, %v156_v21  ;;  %v407_v21 = vld [vmem:[#allocation7 + $0x280] sm:$0xff] }
  0xa1   :  { %v153_v22 = vpop.f32.mrf.mxu2  ;;  %662 = vmatpush.msra.mxu1 %v579_v34  ;;  %v516_v34 = vld [vmem:[#allocation7 + $0x5e8] sm:$0xff] }
  0xa2   :  { %v154_v23 = vadd.f32 %v1167_v18, %v153_v22  ;;  %v467_v18 = vld [vmem:[#allocation7 + $0x460] sm:$0xff] }
  0xa3   :  { %663 = vmatpush.msra.mxu1 %v575_v36  ;;  %v463_v22 = vld [vmem:[#allocation7 + $0x440] sm:$0xff]  ;;  %651 = vmatpush.msra.mxu0 %v467_v18  ;;  %v468_v18 = vld [vmem:[#allocation7 + $0x468] sm:$0xff] }
  0xa4   :  { %v157_v24 = vmax.f32 %v154_v23, 0.0  ;;  %v527_v23 = vld [vmem:[#allocation7 + $0x640] sm:$0xff] }
  0xa5   :  { %664 = vmatpush.msra.mxu1 %v571_v38  ;;  %652 = vmatpush.msra.mxu0 %v463_v22  ;;  %v331_v36 = vld [vmem:[#allocation7 + $0x20] sm:$0xff]  ;;  %v512_v38 = vld [vmem:[#allocation7 + $0x5c8] sm:$0xff] }
  0xa6   :  { %1141 = vmatmul.msk.f32.vlgmr.msra.gmra.mxu3 %vm126_vm0, %v157_v24  ;;  %v339_v24 = vld [vmem:[#allocation7 + $0x60] sm:$0xff]  ;;  %v464_v22 = vld [vmem:[#allocation7 + $0x448] sm:$0xff] }
  0xa7   :  { %616 = vmatpush.msra.mxu3 %v451_v40  ;;  %665 = vmatpush.msra.mxu1 %v567_v44  ;;  %v327_v40 = vld [vmem:[#allocation7] sm:$0xff]  ;;  %v388_v44 = vld [vmem:[#allocation7 + $0x1e8] sm:$0xff] }
  0xa8   :  { %605 = vmatpush.msra.mxu2 %v339_v24  ;;  %653 = vmatpush.msra.mxu0 %v459_v28  ;;  %v344_v24 = vld [vmem:[#allocation7 + $0x88] sm:$0xff] }
  0xa9   :  { %617 = vmatpush.msra.mxu3 %v447_v42  ;;  %666 = vmatpush.msra.mxu1 %v563_v48  ;;  %v508_v42 = vld [vmem:[#allocation7 + $0x5a8] sm:$0xff] }
  0xaa   :  { %606 = vmatpush.msra.mxu2 %v335_v30  ;;  %654 = vmatpush.msra.mxu0 %v455_v32  ;;  %v384_v48 = vld [vmem:[#allocation7 + $0x1c8] sm:$0xff] }
  0xab   :  { %618 = vmatpush.msra.mxu3 %v443_v46  ;;  %667 = vmatpush.msra.mxu1 %v559_v52  ;;  %v504_v46 = vld [vmem:[#allocation7 + $0x588] sm:$0xff] }
  0xac   :  { %607 = vmatpush.msra.mxu2 %v331_v36  ;;  %v380_v52 = vld [vmem:[#allocation7 + $0x1a8] sm:$0xff] }
  0xad   :  { %619 = vmatpush.msra.mxu3 %v439_v50  ;;  %668 = vmatpush.msra.mxu1 %v555_v56  ;;  %v500_v50 = vld [vmem:[#allocation7 + $0x568] sm:$0xff] }
  0xae   :  { %608 = vmatpush.msra.mxu2 %v327_v40  ;;  %v376_v56 = vld [vmem:[#allocation7 + $0x188] sm:$0xff] }
  0xaf   :  { %620 = vmatpush.msra.mxu3 %v435_v54  ;;  %669 = vmatpush.msra.mxu1 %v551_v60  ;;  %v496_v54 = vld [vmem:[#allocation7 + $0x548] sm:$0xff] }
  0xb0   :  { %v372_v60 = vld [vmem:[#allocation7 + $0x168] sm:$0xff] }
  0xb1   :  { %621 = vmatpush.msra.mxu3 %v431_v58  ;;  %670 = vmatpush.msra.mxu1 %v547_v1  ;;  %v492_v58 = vld [vmem:[#allocation7 + $0x528] sm:$0xff] }
  0xb2   :  { %v432_v1 = vld [vmem:[#allocation7 + $0x348] sm:$0xff] }
  0xb3   :  { %622 = vmatpush.msra.mxu3 %v427_v63  ;;  %671 = vmatpush.msra.mxu1 %v543_v7  ;;  %v552_v63 = vld [vmem:[#allocation7 + $0x708] sm:$0xff] }
  0xb4   :  { %v544_v7 = vld [vmem:[#allocation7 + $0x6c8] sm:$0xff] }
  0xb5   :  { %623 = vmatpush.msra.mxu3 %v423_v3  ;;  %672 = vmatpush.msra.mxu1 %v539_v11  ;;  %v548_v3 = vld [vmem:[#allocation7 + $0x6e8] sm:$0xff] }
  0xb6   :  { %v540_v11 = vld [vmem:[#allocation7 + $0x6a8] sm:$0xff] }
  0xb7   :  { %624 = vmatpush.msra.mxu3 %v419_v9  ;;  %673 = vmatpush.msra.mxu1 %v535_v15  ;;  %v424_v9 = vld [vmem:[#allocation7 + $0x308] sm:$0xff] }
  0xb8   :  { %v536_v15 = vld [vmem:[#allocation7 + $0x688] sm:$0xff] }
  0xb9   :  { %625 = vmatpush.msra.mxu3 %v415_v13  ;;  %674 = vmatpush.msra.mxu1 %v531_v19  ;;  %v420_v13 = vld [vmem:[#allocation7 + $0x2e8] sm:$0xff] }
  0xba   :  { %v532_v19 = vld [vmem:[#allocation7 + $0x668] sm:$0xff] }
  0xbb   :  { %626 = vmatpush.msra.mxu3 %v411_v17  ;;  %675 = vmatpush.msra.mxu1 %v527_v23  ;;  %v416_v17 = vld [vmem:[#allocation7 + $0x2c8] sm:$0xff] }
  0xbc   :  { %v528_v23 = vld [vmem:[#allocation7 + $0x648] sm:$0xff] }
  0xbd   :  { %627 = vmatpush.msra.mxu3 %v407_v21  ;;  %676 = vmatpush.msra.mxu1 %v523_v29  ;;  %v412_v21 = vld [vmem:[#allocation7 + $0x2a8] sm:$0xff] }
  0xbe   :  { %v340_v28 = vld [vmem:[#allocation7 + $0x68] sm:$0xff] }
  0xbf   :  { %628 = vmatpush.msra.mxu3 %v403_v25  ;;  %677 = vmatpush.msra.mxu1 %v519_v33  ;;  %v408_v25 = vld [vmem:[#allocation7 + $0x288] sm:$0xff] }
  0xc0   :  { %v404_v29 = vld [vmem:[#allocation7 + $0x268] sm:$0xff] }
  0xc1   :  { %629 = vmatpush.msra.mxu3 %v399_v31  ;;  %v456_v30 = vld [vmem:[#allocation7 + $0x408] sm:$0xff] }
  0xc2   :  { %v520_v31 = vld [vmem:[#allocation7 + $0x608] sm:$0xff] }
  0xc3   :  { %630 = vmatpush.msra.mxu3 %v395_v37  ;;  %v336_v32 = vld [vmem:[#allocation7 + $0x48] sm:$0xff] }
  0xc4   :  { %v400_v33 = vld [vmem:[#allocation7 + $0x248] sm:$0xff] }
  0xc5   :  { %631 = vmatpush.msra.mxu3 %v391_v41  ;;  %v328_v36 = vld [vmem:[#allocation7 + $0x8] sm:$0xff] }
  0xc6   :  { %v392_v37 = vld [vmem:[#allocation7 + $0x208] sm:$0xff] }
 0x11d   :  { %v189_v4 = vpop.f32.mrf.mxu1 }
 0x11e   :  { %v190_v5 = vadd.f32 %v1168_v61, %v189_v4  ;;  %v364_v4 = vld [vmem:[#allocation7 + $0x128] sm:$0xff] }
 0x120   :  { %1142 = vmatmul.msk.f32.vlgmr.msrb.gmra.mxu2 %vm126_vm0, %v190_v5  ;;  %1144 = vmatmul.msk.f32.vlgmr.msrb.gmra.mxu3 %vm126_vm0, %v190_v5 }
 0x121   :  { %1146 = vmatmul.msk.f32.vlgmr.msrb.gmra.mxu0 %vm126_vm0, %v190_v5  ;;  %1148 = vmatmul.msk.f32.vlgmr.msrb.gmra.mxu1 %vm126_vm0, %v190_v5  ;;  %v428_v5 = vld [vmem:[#allocation7 + $0x328] sm:$0xff] }
 0x122   :  { %731 = vmatpush.msrb.mxu0 %v516_v34  ;;  %754 = vmatpush.msrb.mxu1 %v580_v35  ;;  %v332_v34 = vld [vmem:[#allocation7 + $0x28] sm:$0xff] }
 0x123   :  { %685 = vmatpush.msrb.mxu2 %v388_v44  ;;  %708 = vmatpush.msrb.mxu3 %v452_v45  ;;  %v396_v35 = vld [vmem:[#allocation7 + $0x228] sm:$0xff] }
 0x124   :  { %732 = vmatpush.msrb.mxu0 %v512_v38  ;;  %755 = vmatpush.msrb.mxu1 %v576_v39  ;;  %v1416_v38 = vld [vmem:[%s1502_s6] sm:$0xf] }
 0x125   :  { %686 = vmatpush.msrb.mxu2 %v384_v48  ;;  %709 = vmatpush.msrb.mxu3 %v448_v49  ;;  %v215_v39 = vperm.slane %v1416_v38, 2  ;;  %v216_v40 = vperm.slane %v1416_v38, 3  ;;  %v213_v45 = vperm.slane %v1416_v38, 0  ;;  %v517_v49 = vld [vmem:[#allocation7 + $0x5f0] sm:$0xff] }
 0x126   :  { %733 = vmatpush.msrb.mxu0 %v508_v42  ;;  %756 = vmatpush.msrb.mxu1 %v572_v43 }
 0x127   :  { %687 = vmatpush.msrb.mxu2 %v380_v52  ;;  %710 = vmatpush.msrb.mxu3 %v444_v53  ;;  %v513_v53 = vld [vmem:[#allocation7 + $0x5d0] sm:$0xff] }
 0x128   :  { %734 = vmatpush.msrb.mxu0 %v504_v46  ;;  %757 = vmatpush.msrb.mxu1 %v568_v47  ;;  %v214_v46 = vperm.slane %v1416_v38, 1  ;;  %v425_v38 = vld [vmem:[#allocation7 + $0x310] sm:$0xff] }
 0x129   :  { %v192_v26 = vpop.f32.mrf.mxu3  ;;  %688 = vmatpush.msrb.mxu2 %v376_v56  ;;  %711 = vmatpush.msrb.mxu3 %v440_v57  ;;  %v509_v57 = vld [vmem:[#allocation7 + $0x5b0] sm:$0xff] }
 0x12a   :  { %v193_v27 = vadd.f32 %v1168_v61, %v192_v26  ;;  %735 = vmatpush.msrb.mxu0 %v500_v50  ;;  %758 = vmatpush.msrb.mxu1 %v564_v51  ;;  %v436_v61 = vld [vmem:[#allocation7 + $0x368] sm:$0xff]  ;;  %v581_v50 = vld [vmem:[#allocation7 + $0x7f0] sm:$0xff] }
 0x12b   :  { %689 = vmatpush.msrb.mxu2 %v372_v60  ;;  %712 = vmatpush.msrb.mxu3 %v436_v61  ;;  %v460_v26 = vld [vmem:[#allocation7 + $0x428] sm:$0xff]  ;;  %v389_v61 = vld [vmem:[#allocation7 + $0x1f0] sm:$0xff] }
 0x12c   :  { %1143 = vmatmul.msk.f32.gmra.mxu2 %vm126_vm0, %v193_v27  ;;  %1145 = vmatmul.msk.f32.gmra.mxu3 %vm126_vm0, %v193_v27 }
 0x12d   :  { %1147 = vmatmul.msk.f32.gmra.mxu0 %vm126_vm0, %v193_v27  ;;  %1149 = vmatmul.msk.f32.gmra.mxu1 %vm126_vm0, %v193_v27  ;;  %v524_v27 = vld [vmem:[#allocation7 + $0x628] sm:$0xff] }
 0x12e   :  { %736 = vmatpush.msrb.mxu0 %v496_v54  ;;  %759 = vmatpush.msrb.mxu1 %v560_v55  ;;  %v577_v54 = vld [vmem:[#allocation7 + $0x7d0] sm:$0xff] }
 0x12f   :  { %690 = vmatpush.msrb.mxu2 %v368_v0  ;;  %713 = vmatpush.msrb.mxu3 %v432_v1  ;;  %v569_v0 = vld [vmem:[#allocation7 + $0x790] sm:$0xff] }
 0x130   :  { %737 = vmatpush.msrb.mxu0 %v492_v58  ;;  %760 = vmatpush.msrb.mxu1 %v556_v59  ;;  %v573_v58 = vld [vmem:[#allocation7 + $0x7b0] sm:$0xff] }
 0x131   :  { %691 = vmatpush.msrb.mxu2 %v364_v4  ;;  %714 = vmatpush.msrb.mxu3 %v428_v5  ;;  %v385_v1 = vld [vmem:[#allocation7 + $0x1d0] sm:$0xff] }
 0x132   :  { %738 = vmatpush.msrb.mxu0 %v488_v62  ;;  %761 = vmatpush.msrb.mxu1 %v552_v63  ;;  %v453_v62 = vld [vmem:[#allocation7 + $0x3f0] sm:$0xff] }
 0x133   :  { %692 = vmatpush.msrb.mxu2 %v360_v8  ;;  %715 = vmatpush.msrb.mxu3 %v424_v9  ;;  %v505_v63 = vld [vmem:[#allocation7 + $0x590] sm:$0xff] }
 0x134   :  { %739 = vmatpush.msrb.mxu0 %v484_v2  ;;  %762 = vmatpush.msrb.mxu1 %v548_v3  ;;  %v449_v2 = vld [vmem:[#allocation7 + $0x3d0] sm:$0xff] }
 0x135   :  { %693 = vmatpush.msrb.mxu2 %v356_v12  ;;  %716 = vmatpush.msrb.mxu3 %v420_v13  ;;  %v501_v5 = vld [vmem:[#allocation7 + $0x570] sm:$0xff] }
 0x136   :  { %740 = vmatpush.msrb.mxu0 %v480_v6  ;;  %763 = vmatpush.msrb.mxu1 %v544_v7  ;;  %v565_v6 = vld [vmem:[#allocation7 + $0x770] sm:$0xff] }
 0x137   :  { %694 = vmatpush.msrb.mxu2 %v352_v16  ;;  %717 = vmatpush.msrb.mxu3 %v416_v17  ;;  %v381_v9 = vld [vmem:[#allocation7 + $0x1b0] sm:$0xff] }
 0x138   :  { %741 = vmatpush.msrb.mxu0 %v476_v10  ;;  %764 = vmatpush.msrb.mxu1 %v540_v11  ;;  %v445_v10 = vld [vmem:[#allocation7 + $0x3b0] sm:$0xff] }
 0x139   :  { %695 = vmatpush.msrb.mxu2 %v348_v20  ;;  %718 = vmatpush.msrb.mxu3 %v412_v21  ;;  %v497_v11 = vld [vmem:[#allocation7 + $0x550] sm:$0xff] }
 0x13a   :  { %742 = vmatpush.msrb.mxu0 %v472_v14  ;;  %765 = vmatpush.msrb.mxu1 %v536_v15  ;;  %v561_v12 = vld [vmem:[#allocation7 + $0x750] sm:$0xff] }
 0x13b   :  { %696 = vmatpush.msrb.mxu2 %v344_v24  ;;  %719 = vmatpush.msrb.mxu3 %v408_v25  ;;  %v377_v15 = vld [vmem:[#allocation7 + $0x190] sm:$0xff] }
 0x13c   :  { %743 = vmatpush.msrb.mxu0 %v468_v18  ;;  %766 = vmatpush.msrb.mxu1 %v532_v19  ;;  %v441_v16 = vld [vmem:[#allocation7 + $0x390] sm:$0xff] }
 0x13d   :  { %697 = vmatpush.msrb.mxu2 %v340_v28  ;;  %720 = vmatpush.msrb.mxu3 %v404_v29  ;;  %v493_v17 = vld [vmem:[#allocation7 + $0x530] sm:$0xff] }
 0x13e   :  { %744 = vmatpush.msrb.mxu0 %v464_v22  ;;  %767 = vmatpush.msrb.mxu1 %v528_v23  ;;  %v557_v18 = vld [vmem:[#allocation7 + $0x730] sm:$0xff] }
 0x13f   :  { %698 = vmatpush.msrb.mxu2 %v336_v32  ;;  %721 = vmatpush.msrb.mxu3 %v400_v33  ;;  %v373_v23 = vld [vmem:[#allocation7 + $0x170] sm:$0xff] }
 0x140   :  { %745 = vmatpush.msrb.mxu0 %v460_v26  ;;  %768 = vmatpush.msrb.mxu1 %v524_v27  ;;  %v437_v24 = vld [vmem:[#allocation7 + $0x370] sm:$0xff] }
 0x141   :  { %699 = vmatpush.msrb.mxu2 %v332_v34  ;;  %722 = vmatpush.msrb.mxu3 %v396_v35  ;;  %v489_v25 = vld [vmem:[#allocation7 + $0x510] sm:$0xff] }
 0x142   :  { %746 = vmatpush.msrb.mxu0 %v456_v30  ;;  %769 = vmatpush.msrb.mxu1 %v520_v31  ;;  %v553_v26 = vld [vmem:[#allocation7 + $0x710] sm:$0xff] }
 0x143   :  { %700 = vmatpush.msrb.mxu2 %v328_v36  ;;  %723 = vmatpush.msrb.mxu3 %v392_v37  ;;  %v369_v27 = vld [vmem:[#allocation7 + $0x150] sm:$0xff] }
 0x144   :  { %v433_v28 = vld [vmem:[#allocation7 + $0x350] sm:$0xff] }
 0x145   :  { %v485_v31 = vld [vmem:[#allocation7 + $0x4f0] sm:$0xff] }
 0x146   :  { %v549_v32 = vld [vmem:[#allocation7 + $0x6f0] sm:$0xff] }
 0x147   :  { %v365_v33 = vld [vmem:[#allocation7 + $0x130] sm:$0xff] }
 0x148   :  { %v429_v34 = vld [vmem:[#allocation7 + $0x330] sm:$0xff] }
 0x149   :  { %v481_v35 = vld [vmem:[#allocation7 + $0x4d0] sm:$0xff] }
 0x14a   :  { %v545_v36 = vld [vmem:[#allocation7 + $0x6d0] sm:$0xff] }
 0x14b   :  { %v361_v37 = vld [vmem:[#allocation7 + $0x110] sm:$0xff] }
 0x19e   :  { %v290_v41 = vpop.f32.mrf.mxu0  ;;  %v313_v42 = vpop.f32.mrf.mxu1 }
 0x19f   :  { %v291_v43 = vadd.f32 %v290_v41, %v215_v39  ;;  %v314_v44 = vadd.f32 %v313_v42, %v216_v40  ;;  %v357_v41 = vld [vmem:[#allocation7 + $0xf0] sm:$0xff] }
 0x1a0   :  { %v421_v42 = vld [vmem:[#allocation7 + $0x2f0] sm:$0xff] }
 0x1a1   :  { %v1422_v47 = vmax.f32 %v291_v43, 0.0  ;;  %v1424_v48 = vmax.f32 %v314_v44, 0.0  ;;  %v473_v43 = vld [vmem:[#allocation7 + $0x490] sm:$0xff] }
 0x1a2   :  { %v537_v44 = vld [vmem:[#allocation7 + $0x690] sm:$0xff] }
 0x1a3   :  { %655 = vmatmul.f32.vlgmr.msra.gmra.mxu0 %v1422_v47  ;;  %678 = vmatmul.f32.vlgmr.msra.gmra.mxu1 %v1424_v48  ;;  %v244_v51 = vpop.f32.mrf.mxu2  ;;  %v267_v52 = vpop.f32.mrf.mxu3 }
 0x1a4   :  { %823 = vmatpush.msra.mxu0 %v517_v49  ;;  %846 = vmatpush.msra.mxu1 %v581_v50  ;;  %v245_v55 = vadd.f32 %v244_v51, %v213_v45  ;;  %v268_v56 = vadd.f32 %v267_v52, %v214_v46  ;;  %v469_v49 = vld [vmem:[#allocation7 + $0x470] sm:$0xff] }
 0x1a5   :  { %v533_v50 = vld [vmem:[#allocation7 + $0x670] sm:$0xff] }
 0x1a6   :  { %v1432_v59 = vmax.f32 %v245_v55, 0.0  ;;  %v1434_v60 = vmax.f32 %v268_v56, 0.0  ;;  %824 = vmatpush.msra.mxu0 %v513_v53  ;;  %847 = vmatpush.msra.mxu1 %v577_v54  ;;  %v349_v51 = vld [vmem:[#allocation7 + $0xb0] sm:$0xff] }
 0x1a7   :  { %v413_v52 = vld [vmem:[#allocation7 + $0x2b0] sm:$0xff] }
 0x1a8   :  { %825 = vmatpush.msra.mxu0 %v509_v57  ;;  %848 = vmatpush.msra.mxu1 %v573_v58  ;;  %v465_v53 = vld [vmem:[#allocation7 + $0x450] sm:$0xff] }
 0x1a9   :  { %609 = vmatmul.f32.vlgmr.msra.gmra.mxu2 %v1432_v59  ;;  %632 = vmatmul.f32.vlgmr.msra.gmra.mxu3 %v1434_v60  ;;  %v529_v54 = vld [vmem:[#allocation7 + $0x650] sm:$0xff] }
 0x1aa   :  { %777 = vmatpush.msra.mxu2 %v389_v61  ;;  %800 = vmatpush.msra.mxu3 %v453_v62  ;;  %v293_v3 = vpop.f32.mrf.mxu0  ;;  %v316_v4 = vpop.f32.mrf.mxu1  ;;  %v345_v55 = vld [vmem:[#allocation7 + $0x90] sm:$0xff] }
 0x1ab   :  { %826 = vmatpush.msra.mxu0 %v505_v63  ;;  %849 = vmatpush.msra.mxu1 %v569_v0  ;;  %v294_v7 = vadd.f32 %v293_v3, %v215_v39  ;;  %v317_v8 = vadd.f32 %v316_v4, %v216_v40  ;;  %v477_v39 = vld [vmem:[#allocation7 + $0x4b0] sm:$0xff] }
 0x1ac   :  { %778 = vmatpush.msra.mxu2 %v385_v1  ;;  %801 = vmatpush.msra.mxu3 %v449_v2  ;;  %v541_v40 = vld [vmem:[#allocation7 + $0x6b0] sm:$0xff]  ;;  %v518_v1 = vld [vmem:[#allocation7 + $0x5f8] sm:$0xff] }
 0x1ad   :  { %v1438_v13 = vmax.f32 %v294_v7, 0.0  ;;  %v1440_v14 = vmax.f32 %v317_v8, 0.0  ;;  %827 = vmatpush.msra.mxu0 %v501_v5  ;;  %850 = vmatpush.msra.mxu1 %v565_v6  ;;  %v409_v56 = vld [vmem:[#allocation7 + $0x290] sm:$0xff]  ;;  %v582_v2 = vld [vmem:[#allocation7 + $0x7f8] sm:$0xff] }
 0x1ae   :  { %779 = vmatpush.msra.mxu2 %v381_v9  ;;  %802 = vmatpush.msra.mxu3 %v445_v10  ;;  %v461_v57 = vld [vmem:[#allocation7 + $0x430] sm:$0xff]  ;;  %v514_v5 = vld [vmem:[#allocation7 + $0x5d8] sm:$0xff] }
 0x1af   :  { %828 = vmatpush.msra.mxu0 %v497_v11  ;;  %851 = vmatpush.msra.mxu1 %v561_v12  ;;  %v247_v19 = vpop.f32.mrf.mxu2  ;;  %v270_v20 = vpop.f32.mrf.mxu3  ;;  %v525_v58 = vld [vmem:[#allocation7 + $0x630] sm:$0xff]  ;;  %v578_v6 = vld [vmem:[#allocation7 + $0x7d8] sm:$0xff] }
 0x1b0   :  { %658 = vmatmul.f32.gmra.mxu0 %v1438_v13  ;;  %681 = vmatmul.f32.gmra.mxu1 %v1440_v14  ;;  %v248_v21 = vadd.f32 %v247_v19, %v213_v45  ;;  %v271_v22 = vadd.f32 %v270_v20, %v214_v46  ;;  %v353_v45 = vld [vmem:[#allocation7 + $0xd0] sm:$0xff]  ;;  %v510_v9 = vld [vmem:[#allocation7 + $0x5b8] sm:$0xff] }
 0x1b1   :  { %780 = vmatpush.msra.mxu2 %v377_v15  ;;  %803 = vmatpush.msra.mxu3 %v441_v16  ;;  %v417_v46 = vld [vmem:[#allocation7 + $0x2d0] sm:$0xff]  ;;  %v574_v10 = vld [vmem:[#allocation7 + $0x7b8] sm:$0xff] }
 0x1b2   :  { %829 = vmatpush.msra.mxu0 %v493_v17  ;;  %852 = vmatpush.msra.mxu1 %v557_v18  ;;  %v1448_v29 = vmax.f32 %v248_v21, 0.0  ;;  %v1450_v30 = vmax.f32 %v271_v22, 0.0  ;;  %v341_v61 = vld [vmem:[#allocation7 + $0x70] sm:$0xff]  ;;  %v390_v15 = vld [vmem:[#allocation7 + $0x1f8] sm:$0xff] }
 0x1b3   :  { %781 = vmatpush.msra.mxu2 %v373_v23  ;;  %804 = vmatpush.msra.mxu3 %v437_v24  ;;  %v405_v62 = vld [vmem:[#allocation7 + $0x270] sm:$0xff]  ;;  %v454_v16 = vld [vmem:[#allocation7 + $0x3f8] sm:$0xff] }
 0x1b4   :  { %830 = vmatpush.msra.mxu0 %v489_v25  ;;  %853 = vmatpush.msra.mxu1 %v553_v26  ;;  %v457_v63 = vld [vmem:[#allocation7 + $0x410] sm:$0xff]  ;;  %v506_v17 = vld [vmem:[#allocation7 + $0x598] sm:$0xff] }
 0x1b5   :  { %782 = vmatpush.msra.mxu2 %v369_v27  ;;  %805 = vmatpush.msra.mxu3 %v433_v28  ;;  %v521_v0 = vld [vmem:[#allocation7 + $0x610] sm:$0xff]  ;;  %v570_v18 = vld [vmem:[#allocation7 + $0x798] sm:$0xff] }
 0x1b6   :  { %831 = vmatpush.msra.mxu0 %v485_v31  ;;  %854 = vmatpush.msra.mxu1 %v549_v32  ;;  %v337_v3 = vld [vmem:[#allocation7 + $0x50] sm:$0xff]  ;;  %v386_v19 = vld [vmem:[#allocation7 + $0x1d8] sm:$0xff] }
 0x1b7   :  { %612 = vmatmul.f32.gmra.mxu2 %v1448_v29  ;;  %635 = vmatmul.f32.gmra.mxu3 %v1450_v30  ;;  %v401_v4 = vld [vmem:[#allocation7 + $0x250] sm:$0xff]  ;;  %v450_v20 = vld [vmem:[#allocation7 + $0x3d8] sm:$0xff] }
 0x1b8   :  { %783 = vmatpush.msra.mxu2 %v365_v33  ;;  %806 = vmatpush.msra.mxu3 %v429_v34  ;;  %v333_v7 = vld [vmem:[#allocation7 + $0x30] sm:$0xff]  ;;  %v502_v21 = vld [vmem:[#allocation7 + $0x578] sm:$0xff] }
 0x1b9   :  { %832 = vmatpush.msra.mxu0 %v481_v35  ;;  %855 = vmatpush.msra.mxu1 %v545_v36  ;;  %v397_v8 = vld [vmem:[#allocation7 + $0x230] sm:$0xff]  ;;  %v566_v22 = vld [vmem:[#allocation7 + $0x778] sm:$0xff] }
 0x1ba   :  { %747 = vmatmul.f32.vlgmr.msrb.gmra.mxu0 %v1422_v47  ;;  %770 = vmatmul.f32.vlgmr.msrb.gmra.mxu1 %v1424_v48  ;;  %v329_v11 = vld [vmem:[#allocation7 + $0x10] sm:$0xff]  ;;  %v382_v23 = vld [vmem:[#allocation7 + $0x1b8] sm:$0xff] }
 0x1bb   :  { %784 = vmatpush.msra.mxu2 %v361_v37  ;;  %807 = vmatpush.msra.mxu3 %v425_v38  ;;  %v393_v12 = vld [vmem:[#allocation7 + $0x210] sm:$0xff]  ;;  %v446_v24 = vld [vmem:[#allocation7 + $0x3b8] sm:$0xff] }
 0x1bc   :  { %833 = vmatpush.msra.mxu0 %v477_v39  ;;  %856 = vmatpush.msra.mxu1 %v541_v40  ;;  %v498_v25 = vld [vmem:[#allocation7 + $0x558] sm:$0xff] }
 0x1bd   :  { %785 = vmatpush.msra.mxu2 %v357_v41  ;;  %808 = vmatpush.msra.mxu3 %v421_v42  ;;  %v562_v26 = vld [vmem:[#allocation7 + $0x758] sm:$0xff] }
 0x1be   :  { %834 = vmatpush.msra.mxu0 %v473_v43  ;;  %857 = vmatpush.msra.mxu1 %v537_v44  ;;  %v378_v27 = vld [vmem:[#allocation7 + $0x198] sm:$0xff] }
 0x1bf   :  { %786 = vmatpush.msra.mxu2 %v353_v45  ;;  %809 = vmatpush.msra.mxu3 %v417_v46  ;;  %v442_v28 = vld [vmem:[#allocation7 + $0x398] sm:$0xff] }
 0x1c0   :  { %835 = vmatpush.msra.mxu0 %v469_v49  ;;  %858 = vmatpush.msra.mxu1 %v533_v50  ;;  %v494_v31 = vld [vmem:[#allocation7 + $0x538] sm:$0xff] }
 0x1c1   :  { %701 = vmatmul.f32.vlgmr.msrb.gmra.mxu2 %v1432_v59  ;;  %724 = vmatmul.f32.vlgmr.msrb.gmra.mxu3 %v1434_v60  ;;  %v558_v32 = vld [vmem:[#allocation7 + $0x738] sm:$0xff] }
 0x1c2   :  { %787 = vmatpush.msra.mxu2 %v349_v51  ;;  %810 = vmatpush.msra.mxu3 %v413_v52  ;;  %v374_v33 = vld [vmem:[#allocation7 + $0x178] sm:$0xff] }
 0x1c3   :  { %836 = vmatpush.msra.mxu0 %v465_v53  ;;  %859 = vmatpush.msra.mxu1 %v529_v54  ;;  %v438_v34 = vld [vmem:[#allocation7 + $0x378] sm:$0xff] }
 0x1c4   :  { %750 = vmatmul.f32.gmra.mxu0 %v1438_v13  ;;  %773 = vmatmul.f32.gmra.mxu1 %v1440_v14  ;;  %v490_v35 = vld [vmem:[#allocation7 + $0x518] sm:$0xff] }
 0x1c5   :  { %788 = vmatpush.msra.mxu2 %v345_v55  ;;  %811 = vmatpush.msra.mxu3 %v409_v56  ;;  %v554_v36 = vld [vmem:[#allocation7 + $0x718] sm:$0xff] }
 0x1c6   :  { %837 = vmatpush.msra.mxu0 %v461_v57  ;;  %860 = vmatpush.msra.mxu1 %v525_v58  ;;  %v370_v37 = vld [vmem:[#allocation7 + $0x158] sm:$0xff] }
 0x1c7   :  { %789 = vmatpush.msra.mxu2 %v341_v61  ;;  %812 = vmatpush.msra.mxu3 %v405_v62  ;;  %v434_v38 = vld [vmem:[#allocation7 + $0x358] sm:$0xff] }
 0x1c8   :  { %838 = vmatpush.msra.mxu0 %v457_v63  ;;  %861 = vmatpush.msra.mxu1 %v521_v0  ;;  %v486_v39 = vld [vmem:[#allocation7 + $0x4f8] sm:$0xff] }
 0x1c9   :  { %790 = vmatpush.msra.mxu2 %v337_v3  ;;  %813 = vmatpush.msra.mxu3 %v401_v4  ;;  %v550_v40 = vld [vmem:[#allocation7 + $0x6f8] sm:$0xff] }
 0x1ca   :  { %915 = vmatpush.msrb.mxu0 %v518_v1  ;;  %938 = vmatpush.msrb.mxu1 %v582_v2  ;;  %v366_v41 = vld [vmem:[#allocation7 + $0x138] sm:$0xff] }
 0x1cb   :  { %704 = vmatmul.f32.gmra.mxu2 %v1448_v29  ;;  %727 = vmatmul.f32.gmra.mxu3 %v1450_v30  ;;  %v430_v42 = vld [vmem:[#allocation7 + $0x338] sm:$0xff] }
 0x1cc   :  { %916 = vmatpush.msrb.mxu0 %v514_v5  ;;  %939 = vmatpush.msrb.mxu1 %v578_v6  ;;  %v482_v43 = vld [vmem:[#allocation7 + $0x4d8] sm:$0xff] }
 0x1cd   :  { %791 = vmatpush.msra.mxu2 %v333_v7  ;;  %814 = vmatpush.msra.mxu3 %v397_v8  ;;  %v546_v44 = vld [vmem:[#allocation7 + $0x6d8] sm:$0xff] }
 0x1ce   :  { %917 = vmatpush.msrb.mxu0 %v510_v9  ;;  %940 = vmatpush.msrb.mxu1 %v574_v10  ;;  %v362_v45 = vld [vmem:[#allocation7 + $0x118] sm:$0xff] }
 0x1cf   :  { %792 = vmatpush.msra.mxu2 %v329_v11  ;;  %815 = vmatpush.msra.mxu3 %v393_v12  ;;  %v426_v46 = vld [vmem:[#allocation7 + $0x318] sm:$0xff] }
 0x1d0   :  { %839 = vmatmul.f32.vlgmr.msra.gmra.mxu0 %v1422_v47  ;;  %862 = vmatmul.f32.vlgmr.msra.gmra.mxu1 %v1424_v48  ;;  %v478_v49 = vld [vmem:[#allocation7 + $0x4b8] sm:$0xff] }
 0x1d1   :  { %869 = vmatpush.msrb.mxu2 %v390_v15  ;;  %892 = vmatpush.msrb.mxu3 %v454_v16  ;;  %v542_v50 = vld [vmem:[#allocation7 + $0x6b8] sm:$0xff] }
 0x1d2   :  { %918 = vmatpush.msrb.mxu0 %v506_v17  ;;  %941 = vmatpush.msrb.mxu1 %v570_v18  ;;  %v358_v51 = vld [vmem:[#allocation7 + $0xf8] sm:$0xff]  ;;  %v983_v18 = vld [vmem:[#allocation9 + $0x70] sm:$0xff] }
 0x1d3   :  { %870 = vmatpush.msrb.mxu2 %v386_v19  ;;  %893 = vmatpush.msrb.mxu3 %v450_v20  ;;  %v422_v52 = vld [vmem:[#allocation7 + $0x2f8] sm:$0xff]  ;;  %v979_v20 = vld [vmem:[#allocation9 + $0x50] sm:$0xff] }
 0x1d4   :  { %919 = vmatpush.msrb.mxu0 %v502_v21  ;;  %942 = vmatpush.msrb.mxu1 %v566_v22  ;;  %v474_v53 = vld [vmem:[#allocation7 + $0x498] sm:$0xff] }
 0x1d5   :  { %871 = vmatpush.msrb.mxu2 %v382_v23  ;;  %894 = vmatpush.msrb.mxu3 %v446_v24  ;;  %v538_v54 = vld [vmem:[#allocation7 + $0x698] sm:$0xff]  ;;  %v973_v23 = vld [vmem:[#allocation9 + $0x20] sm:$0xff] }
 0x1d6   :  { %920 = vmatpush.msrb.mxu0 %v498_v25  ;;  %943 = vmatpush.msrb.mxu1 %v562_v26  ;;  %v354_v55 = vld [vmem:[#allocation7 + $0xd8] sm:$0xff]  ;;  %v971_v25 = vld [vmem:[#allocation9 + $0x10] sm:$0xff]  ;;  %v997_v26 = vld [vmem:[#allocation9 + $0xe0] sm:$0xff] }
 0x1d7   :  { %793 = vmatmul.f32.vlgmr.msra.gmra.mxu2 %v1432_v59  ;;  %816 = vmatmul.f32.vlgmr.msra.gmra.mxu3 %v1434_v60  ;;  %v418_v56 = vld [vmem:[#allocation7 + $0x2d8] sm:$0xff] }
 0x1d8   :  { %872 = vmatpush.msrb.mxu2 %v378_v27  ;;  %895 = vmatpush.msrb.mxu3 %v442_v28  ;;  %v470_v57 = vld [vmem:[#allocation7 + $0x478] sm:$0xff]  ;;  %v970_v27 = vld [vmem:[#allocation9 + $0x8] sm:$0xff] }
 0x1d9   :  { %921 = vmatpush.msrb.mxu0 %v494_v31  ;;  %944 = vmatpush.msrb.mxu1 %v558_v32  ;;  %v534_v58 = vld [vmem:[#allocation7 + $0x678] sm:$0xff]  ;;  %v969_v31 = vld [vmem:[#allocation9] sm:$0xff]  ;;  %v995_v32 = vld [vmem:[#allocation9 + $0xd0] sm:$0xff] }
 0x1da   :  { %842 = vmatmul.f32.gmra.mxu0 %v1438_v13  ;;  %865 = vmatmul.f32.gmra.mxu1 %v1440_v14  ;;  %v350_v61 = vld [vmem:[#allocation7 + $0xb8] sm:$0xff] }
 0x1db   :  { %873 = vmatpush.msrb.mxu2 %v374_v33  ;;  %896 = vmatpush.msrb.mxu3 %v438_v34  ;;  %v414_v62 = vld [vmem:[#allocation7 + $0x2b8] sm:$0xff]  ;;  %v994_v33 = vld [vmem:[#allocation9 + $0xc8] sm:$0xff]  ;;  %v993_v34 = vld [vmem:[#allocation9 + $0xc0] sm:$0xff] }
 0x1dc   :  { %922 = vmatpush.msrb.mxu0 %v490_v35  ;;  %945 = vmatpush.msrb.mxu1 %v554_v36  ;;  %v466_v63 = vld [vmem:[#allocation7 + $0x458] sm:$0xff]  ;;  %v1015_v36 = vld [vmem:[#allocation9 + $0x170] sm:$0xff] }
 0x1dd   :  { %874 = vmatpush.msrb.mxu2 %v370_v37  ;;  %897 = vmatpush.msrb.mxu3 %v434_v38  ;;  %v530_v0 = vld [vmem:[#allocation7 + $0x658] sm:$0xff]  ;;  %v991_v38 = vld [vmem:[#allocation9 + $0xb0] sm:$0xff] }
 0x1de   :  { %923 = vmatpush.msrb.mxu0 %v486_v39  ;;  %946 = vmatpush.msrb.mxu1 %v550_v40  ;;  %v346_v1 = vld [vmem:[#allocation7 + $0x98] sm:$0xff]  ;;  %v1481_v39 = vld [vmem:[%s1504_s8] sm:$0xf] }
 0x1df   :  { %875 = vmatpush.msrb.mxu2 %v366_v41  ;;  %898 = vmatpush.msrb.mxu3 %v430_v42  ;;  %v410_v2 = vld [vmem:[#allocation7 + $0x298] sm:$0xff]  ;;  %v585_v40 = vperm.slane %v1481_v39, 0  ;;  %v990_v42 = vld [vmem:[#allocation9 + $0xa8] sm:$0xff] }
 0x1e0   :  { %924 = vmatpush.msrb.mxu0 %v482_v43  ;;  %947 = vmatpush.msrb.mxu1 %v546_v44  ;;  %v462_v3 = vld [vmem:[#allocation7 + $0x438] sm:$0xff]  ;;  %v1014_v43 = vld [vmem:[#allocation9 + $0x168] sm:$0xff] }
 0x1e1   :  { %796 = vmatmul.f32.gmra.mxu2 %v1448_v29  ;;  %819 = vmatmul.f32.gmra.mxu3 %v1450_v30  ;;  %v526_v4 = vld [vmem:[#allocation7 + $0x638] sm:$0xff] }
 0x1e2   :  { %876 = vmatpush.msrb.mxu2 %v362_v45  ;;  %899 = vmatpush.msrb.mxu3 %v426_v46  ;;  %v342_v5 = vld [vmem:[#allocation7 + $0x78] sm:$0xff]  ;;  %v989_v45 = vld [vmem:[#allocation9 + $0xa0] sm:$0xff] }
 0x1e3   :  { %925 = vmatpush.msrb.mxu0 %v478_v49  ;;  %948 = vmatpush.msrb.mxu1 %v542_v50  ;;  %v406_v6 = vld [vmem:[#allocation7 + $0x278] sm:$0xff]  ;;  %v1013_v46 = vld [vmem:[#allocation9 + $0x160] sm:$0xff] }
 0x1e4   :  { %877 = vmatpush.msrb.mxu2 %v358_v51  ;;  %900 = vmatpush.msrb.mxu3 %v422_v52  ;;  %v458_v7 = vld [vmem:[#allocation7 + $0x418] sm:$0xff] }
 0x1e5   :  { %926 = vmatpush.msrb.mxu0 %v474_v53  ;;  %949 = vmatpush.msrb.mxu1 %v538_v54  ;;  %v522_v8 = vld [vmem:[#allocation7 + $0x618] sm:$0xff]  ;;  %v987_v54 = vld [vmem:[#allocation9 + $0x90] sm:$0xff] }
 0x1e6   :  { %878 = vmatpush.msrb.mxu2 %v354_v55  ;;  %901 = vmatpush.msrb.mxu3 %v418_v56  ;;  %v338_v9 = vld [vmem:[#allocation7 + $0x58] sm:$0xff]  ;;  %v1011_v55 = vld [vmem:[#allocation9 + $0x150] sm:$0xff] }
 0x1e7   :  { %927 = vmatpush.msrb.mxu0 %v470_v57  ;;  %950 = vmatpush.msrb.mxu1 %v534_v58  ;;  %v402_v10 = vld [vmem:[#allocation7 + $0x258] sm:$0xff] }
 0x1e8   :  { %879 = vmatpush.msrb.mxu2 %v350_v61  ;;  %902 = vmatpush.msrb.mxu3 %v414_v62  ;;  %v334_v11 = vld [vmem:[#allocation7 + $0x38] sm:$0xff]  ;;  %v986_v61 = vld [vmem:[#allocation9 + $0x88] sm:$0xff] }
 0x1e9   :  { %928 = vmatpush.msrb.mxu0 %v466_v63  ;;  %951 = vmatpush.msrb.mxu1 %v530_v0  ;;  %v398_v12 = vld [vmem:[#allocation7 + $0x238] sm:$0xff]  ;;  %v1010_v62 = vld [vmem:[#allocation9 + $0x148] sm:$0xff]  ;;  %v985_v63 = vld [vmem:[#allocation9 + $0x80] sm:$0xff] }
 0x1ea   :  { %880 = vmatpush.msrb.mxu2 %v346_v1  ;;  %903 = vmatpush.msrb.mxu3 %v410_v2  ;;  %v330_v15 = vld [vmem:[#allocation7 + $0x18] sm:$0xff]  ;;  %v1009_v1 = vld [vmem:[#allocation9 + $0x140] sm:$0xff] }
 0x1eb   :  { %929 = vmatpush.msrb.mxu0 %v462_v3  ;;  %952 = vmatpush.msrb.mxu1 %v526_v4  ;;  %v394_v16 = vld [vmem:[#allocation7 + $0x218] sm:$0xff]  ;;  %v1007_v3 = vld [vmem:[#allocation9 + $0x130] sm:$0xff] }
 0x1ec   :  { %881 = vmatpush.msrb.mxu2 %v342_v5  ;;  %904 = vmatpush.msrb.mxu3 %v406_v6  ;;  %v984_v17 = vld [vmem:[#allocation9 + $0x78] sm:$0xff] }
 0x1ed   :  { %930 = vmatpush.msrb.mxu0 %v458_v7  ;;  %953 = vmatpush.msrb.mxu1 %v522_v8  ;;  %v980_v19 = vld [vmem:[#allocation9 + $0x58] sm:$0xff]  ;;  %v1006_v7 = vld [vmem:[#allocation9 + $0x128] sm:$0xff] }
 0x1ee   :  { %931 = vmatmul.f32.vlgmr.msrb.gmra.mxu0 %v1422_v47  ;;  %954 = vmatmul.f32.vlgmr.msrb.gmra.mxu1 %v1424_v48  ;;  %v982_v47 = vld [vmem:[#allocation9 + $0x68] sm:$0xff]  ;;  %v981_v48 = vld [vmem:[#allocation9 + $0x60] sm:$0xff]  ;;  %v976_v21 = vld [vmem:[#allocation9 + $0x38] sm:$0xff] }
 0x1ef   :  { %882 = vmatpush.msrb.mxu2 %v338_v9  ;;  %905 = vmatpush.msrb.mxu3 %v402_v10  ;;  %v1000_v22 = vld [vmem:[#allocation9 + $0xf8] sm:$0xff]  ;;  %v1005_v10 = vld [vmem:[#allocation9 + $0x120] sm:$0xff] }
 0x1f0   :  { %v972_v24 = vld [vmem:[#allocation9 + $0x18] sm:$0xff] }
 0x1f1   :  { %883 = vmatpush.msrb.mxu2 %v334_v11  ;;  %906 = vmatpush.msrb.mxu3 %v398_v12  ;;  %v996_v28 = vld [vmem:[#allocation9 + $0xd8] sm:$0xff] }
 0x1f2   :  { %v1016_v35 = vld [vmem:[#allocation9 + $0x178] sm:$0xff] }
 0x1f3   :  { %884 = vmatpush.msrb.mxu2 %v330_v15  ;;  %907 = vmatpush.msrb.mxu3 %v394_v16  ;;  %v992_v37 = vld [vmem:[#allocation9 + $0xb8] sm:$0xff]  ;;  %v586_v16 = vperm.slane %v1481_v39, 1 }
 0x1f4   :  { %885 = vmatmul.f32.vlgmr.msrb.gmra.mxu2 %v1432_v59  ;;  %908 = vmatmul.f32.vlgmr.msrb.gmra.mxu3 %v1434_v60  ;;  %v978_v59 = vld [vmem:[#allocation9 + $0x48] sm:$0xff]  ;;  %v977_v60 = vld [vmem:[#allocation9 + $0x40] sm:$0xff]  ;;  %v988_v50 = vld [vmem:[#allocation9 + $0x98] sm:$0xff] }
 0x1f5   :  { %1037 = vmatpush.msra.mxu2 %v984_v17  ;;  %1060 = vmatpush.msra.mxu3 %v1000_v22  ;;  %v1012_v51 = vld [vmem:[#allocation9 + $0x158] sm:$0xff] }
 0x1f6   :  { %934 = vmatmul.f32.gmra.mxu0 %v1438_v13  ;;  %957 = vmatmul.f32.gmra.mxu1 %v1440_v14  ;;  %v975_v13 = vld [vmem:[#allocation9 + $0x30] sm:$0xff]  ;;  %v974_v14 = vld [vmem:[#allocation9 + $0x28] sm:$0xff]  ;;  %v1008_v2 = vld [vmem:[#allocation9 + $0x138] sm:$0xff] }
 0x1f7   :  { %1038 = vmatpush.msra.mxu2 %v983_v18  ;;  %1083 = vmatpush.msra.mxu0 %v1016_v35  ;;  %v1004_v15 = vld [vmem:[#allocation9 + $0x118] sm:$0xff]  ;;  %v1003_v18 = vld [vmem:[#allocation9 + $0x110] sm:$0xff] }
 0x1f9   :  { %1039 = vmatpush.msra.mxu2 %v982_v47  ;;  %1084 = vmatpush.msra.mxu0 %v1015_v36  ;;  %v1032_v47 = vld [vmem:[#allocation9 + $0x1f8] sm:$0xff] }
 0x1fa   :  { %1106 = vmatpush.msra.mxu1 %v1032_v47 }
 0x1fb   :  { %1040 = vmatpush.msra.mxu2 %v981_v48  ;;  %1085 = vmatpush.msra.mxu0 %v1014_v43 }
 0x1fc   :  { %888 = vmatmul.f32.gmra.mxu2 %v1448_v29  ;;  %911 = vmatmul.f32.gmra.mxu3 %v1450_v30  ;;  %v999_v29 = vld [vmem:[#allocation9 + $0xf0] sm:$0xff]  ;;  %v998_v30 = vld [vmem:[#allocation9 + $0xe8] sm:$0xff] }
 0x1fd   :  { %1041 = vmatpush.msra.mxu2 %v980_v19  ;;  %1061 = vmatpush.msra.mxu3 %v999_v29  ;;  %v1029_v29 = vld [vmem:[#allocation9 + $0x1e0] sm:$0xff] }
 0x1fe   :  { %1086 = vmatpush.msra.mxu0 %v1013_v46 }
 0x1ff   :  { %1042 = vmatpush.msra.mxu2 %v979_v20  ;;  %1062 = vmatpush.msra.mxu3 %v998_v30  ;;  %v1002_v20 = vld [vmem:[#allocation9 + $0x108] sm:$0xff] }
 0x200   :  { %1087 = vmatpush.msra.mxu0 %v1012_v51  ;;  %v1020_v51 = vld [vmem:[#allocation9 + $0x198] sm:$0xff] }
 0x201   :  { %1043 = vmatpush.msra.mxu2 %v978_v59  ;;  %1063 = vmatpush.msra.mxu3 %v997_v26  ;;  %v1031_v59 = vld [vmem:[#allocation9 + $0x1f0] sm:$0xff] }
 0x202   :  { %1088 = vmatpush.msra.mxu0 %v1011_v55  ;;  %1107 = vmatpush.msra.mxu1 %v1031_v59 }
 0x203   :  { %1044 = vmatpush.msra.mxu2 %v977_v60  ;;  %1064 = vmatpush.msra.mxu3 %v996_v28  ;;  %v1026_v28 = vld [vmem:[#allocation9 + $0x1c8] sm:$0xff] }
 0x204   :  { %1089 = vmatpush.msra.mxu0 %v1010_v62  ;;  %v1017_v62 = vld [vmem:[#allocation9 + $0x180] sm:$0xff] }
 0x205   :  { %1045 = vmatpush.msra.mxu2 %v976_v21  ;;  %1065 = vmatpush.msra.mxu3 %v995_v32 }
 0x206   :  { %1090 = vmatpush.msra.mxu0 %v1009_v1 }
 0x207   :  { %1046 = vmatpush.msra.mxu2 %v975_v13  ;;  %1066 = vmatpush.msra.mxu3 %v994_v33  ;;  %v1001_v13 = vld [vmem:[#allocation9 + $0x100] sm:$0xff] }
 0x208   :  { %1091 = vmatpush.msra.mxu0 %v1008_v2  ;;  %v1025_v33 = vld [vmem:[#allocation9 + $0x1c0] sm:$0xff] }
 0x209   :  { %1047 = vmatpush.msra.mxu2 %v974_v14  ;;  %1067 = vmatpush.msra.mxu3 %v993_v34  ;;  %v1030_v14 = vld [vmem:[#allocation9 + $0x1e8] sm:$0xff] }
 0x20a   :  { %1092 = vmatpush.msra.mxu0 %v1007_v3  ;;  %1108 = vmatpush.msra.mxu1 %v1030_v14 }
 0x20b   :  { %1048 = vmatpush.msra.mxu2 %v973_v23  ;;  %1068 = vmatpush.msra.mxu3 %v992_v37  ;;  %v1024_v37 = vld [vmem:[#allocation9 + $0x1b8] sm:$0xff] }
 0x20c   :  { %1093 = vmatpush.msra.mxu0 %v1006_v7  ;;  %1109 = vmatpush.msra.mxu1 %v1029_v29 }
 0x20d   :  { %1049 = vmatpush.msra.mxu2 %v972_v24  ;;  %1069 = vmatpush.msra.mxu3 %v991_v38 }
 0x20e   :  { %1094 = vmatpush.msra.mxu0 %v1005_v10  ;;  %v588_v10 = vperm.slane %v1481_v39, 3 }
 0x20f   :  { %1050 = vmatpush.msra.mxu2 %v971_v25  ;;  %1070 = vmatpush.msra.mxu3 %v990_v42  ;;  %v1028_v25 = vld [vmem:[#allocation9 + $0x1d8] sm:$0xff] }
 0x210   :  { %1095 = vmatpush.msra.mxu0 %v1004_v15  ;;  %1110 = vmatpush.msra.mxu1 %v1028_v25 }
 0x211   :  { %1051 = vmatpush.msra.mxu2 %v970_v27  ;;  %1071 = vmatpush.msra.mxu3 %v989_v45  ;;  %v1027_v27 = vld [vmem:[#allocation9 + $0x1d0] sm:$0xff]  ;;  %v587_v45 = vperm.slane %v1481_v39, 2  ;;  %v1169_v39 = vld [vmem:[%s1506_s10] ss:$0 sm:$0xff] }
 0x212   :  { %1096 = vmatpush.msra.mxu0 %v1003_v18  ;;  %1111 = vmatpush.msra.mxu1 %v1027_v27 }
 0x213   :  { %1052 = vmatpush.msra.mxu2 %v969_v31  ;;  %1072 = vmatpush.msra.mxu3 %v988_v50 }
 0x214   :  { %1097 = vmatpush.msra.mxu0 %v1002_v20  ;;  %1112 = vmatpush.msra.mxu1 %v1026_v28 }
 0x215   :  { %1073 = vmatpush.msra.mxu3 %v987_v54  ;;  %v1019_v54 = vld [vmem:[#allocation9 + $0x190] sm:$0xff] }
 0x216   :  { %1098 = vmatpush.msra.mxu0 %v1001_v13  ;;  %1113 = vmatpush.msra.mxu1 %v1025_v33 }
 0x217   :  { %1074 = vmatpush.msra.mxu3 %v986_v61 }
 0x218   :  { %1114 = vmatpush.msra.mxu1 %v1024_v37 }
 0x219   :  { %1075 = vmatpush.msra.mxu3 %v985_v63 }
 0x220   :  { %v656_v53 = vpop.f32.mrf.mxu0  ;;  %v679_v57 = vpop.f32.mrf.mxu1 }
 0x22c   :  { %v610_v41 = vpop.f32.mrf.mxu2  ;;  %v633_v49 = vpop.f32.mrf.mxu3 }
 0x22d   :  { %v611_v44 = vadd.f32 %v610_v41, %v585_v40  ;;  %v659_v9 = vpop.f32.mrf.mxu0  ;;  %v682_v12 = vpop.f32.mrf.mxu1 }
 0x22f   :  { %v634_v52 = vadd.f32 %v633_v49, %v611_v44  ;;  %v1022_v44 = vld [vmem:[#allocation9 + $0x1a8] sm:$0xff]  ;;  %v1021_v49 = vld [vmem:[#allocation9 + $0x1a0] sm:$0xff] }
 0x231   :  { %v657_v56 = vadd.f32 %v656_v53, %v634_v52 }
 0x233   :  { %v680_v58 = vadd.f32 %v679_v57, %v657_v56  ;;  %v1018_v57 = vld [vmem:[#allocation9 + $0x188] sm:$0xff] }
 0x235   :  { %v961_v0 = vmax.f32 %v680_v58, 0.0 }
 0x237   :  { %1053 = vmatmul.f32.vlgmr.msra.gmra.mxu2 %v961_v0  ;;  %v748_v23 = vpop.f32.mrf.mxu0  ;;  %v771_v30 = vpop.f32.mrf.mxu1 }
 0x23a   :  { %v613_v4 = vpop.f32.mrf.mxu2  ;;  %v636_v6 = vpop.f32.mrf.mxu3 }
 0x23b   :  { %v614_v5 = vadd.f32 %v613_v4, %v585_v40  ;;  %v1023_v40 = vld [vmem:[#allocation9 + $0x1b0] sm:$0xff] }
 0x23c   :  { %1115 = vmatpush.msra.mxu1 %v1023_v40 }
 0x23d   :  { %v637_v8 = vadd.f32 %v636_v6, %v614_v5 }
 0x23e   :  { %1116 = vmatpush.msra.mxu1 %v1022_v44 }
 0x23f   :  { %v660_v11 = vadd.f32 %v659_v9, %v637_v8 }
 0x240   :  { %1117 = vmatpush.msra.mxu1 %v1021_v49 }
 0x241   :  { %v683_v17 = vadd.f32 %v682_v12, %v660_v11  ;;  %v751_v38 = vpop.f32.mrf.mxu0  ;;  %v774_v42 = vpop.f32.mrf.mxu1 }
 0x242   :  { %1118 = vmatpush.msra.mxu1 %v1020_v51 }
 0x243   :  { %v965_v48 = vmax.f32 %v683_v17, 0.0 }
 0x244   :  { %v702_v19 = vpop.f32.mrf.mxu2  ;;  %v725_v21 = vpop.f32.mrf.mxu3  ;;  %1119 = vmatpush.msra.mxu1 %v1019_v54 }
 0x245   :  { %v703_v60 = vadd.f32 %v702_v19, %v586_v16  ;;  %1056 = vmatmul.f32.gmra.mxu2 %v965_v48 }
 0x246   :  { %1120 = vmatpush.msra.mxu1 %v1018_v57 }
 0x247   :  { %v726_v22 = vadd.f32 %v725_v21, %v703_v60 }
 0x248   :  { %1121 = vmatpush.msra.mxu1 %v1017_v62 }
 0x249   :  { %v749_v24 = vadd.f32 %v748_v23, %v726_v22 }
 0x24b   :  { %v772_v26 = vadd.f32 %v771_v30, %v749_v24 }
 0x24d   :  { %v962_v31 = vmax.f32 %v772_v26, 0.0  ;;  %v840_v56 = vpop.f32.mrf.mxu0  ;;  %v863_v61 = vpop.f32.mrf.mxu1 }
 0x24e   :  { %v705_v32 = vpop.f32.mrf.mxu2  ;;  %v728_v35 = vpop.f32.mrf.mxu3 }
 0x24f   :  { %1076 = vmatmul.f32.vlgmr.msra.gmra.mxu3 %v962_v31  ;;  %v706_v34 = vadd.f32 %v705_v32, %v586_v16 }
 0x251   :  { %v729_v36 = vadd.f32 %v728_v35, %v706_v34 }
 0x253   :  { %v752_v41 = vadd.f32 %v751_v38, %v729_v36 }
 0x255   :  { %v775_v43 = vadd.f32 %v774_v42, %v752_v41 }
 0x257   :  { %v966_v46 = vmax.f32 %v775_v43, 0.0  ;;  %v843_v5 = vpop.f32.mrf.mxu0  ;;  %v866_v7 = vpop.f32.mrf.mxu1 }
 0x259   :  { %1079 = vmatmul.f32.gmra.mxu3 %v966_v46 }
 0x25a   :  { %v794_v50 = vpop.f32.mrf.mxu2  ;;  %v817_v53 = vpop.f32.mrf.mxu3 }
 0x25b   :  { %v795_v52 = vadd.f32 %v794_v50, %v587_v45 }
 0x25d   :  { %v818_v55 = vadd.f32 %v817_v53, %v795_v52 }
 0x25f   :  { %v841_v58 = vadd.f32 %v840_v56, %v818_v55 }
 0x261   :  { %v864_v63 = vadd.f32 %v863_v61, %v841_v58 }
 0x263   :  { %v963_v0 = vmax.f32 %v864_v63, 0.0 }
 0x264   :  { %v797_v1 = vpop.f32.mrf.mxu2  ;;  %v820_v3 = vpop.f32.mrf.mxu3 }
 0x265   :  { %v798_v2 = vadd.f32 %v797_v1, %v587_v45  ;;  %1099 = vmatmul.f32.vlgmr.msra.gmra.mxu0 %v963_v0 }
 0x267   :  { %v821_v4 = vadd.f32 %v820_v3, %v798_v2 }
 0x269   :  { %v844_v6 = vadd.f32 %v843_v5, %v821_v4 }
 0x26b   :  { %v867_v8 = vadd.f32 %v866_v7, %v844_v6  ;;  %v932_v16 = vpop.f32.mrf.mxu0  ;;  %v955_v18 = vpop.f32.mrf.mxu1 }
 0x26d   :  { %v967_v9 = vmax.f32 %v867_v8, 0.0 }
 0x26f   :  { %1102 = vmatmul.f32.gmra.mxu0 %v967_v9 }
 0x273   :  { %v935_v13 = vpop.f32.mrf.mxu0  ;;  %v958_v22 = vpop.f32.mrf.mxu1 }
 0x277   :  { %v886_v11 = vpop.f32.mrf.mxu2  ;;  %v909_v12 = vpop.f32.mrf.mxu3 }
 0x278   :  { %v887_v15 = vadd.f32 %v886_v11, %v588_v10 }
 0x27a   :  { %v910_v17 = vadd.f32 %v909_v12, %v887_v15 }
 0x27c   :  { %v933_v47 = vadd.f32 %v932_v16, %v910_v17 }
 0x27e   :  { %v956_v48 = vadd.f32 %v955_v18, %v933_v47 }
 0x27f   :  { %v889_v19 = vpop.f32.mrf.mxu2  ;;  %v912_v60 = vpop.f32.mrf.mxu3 }
 0x280   :  { %v964_v20 = vmax.f32 %v956_v48, 0.0  ;;  %v890_v59 = vadd.f32 %v889_v19, %v588_v10 }
 0x282   :  { %v913_v21 = vadd.f32 %v912_v60, %v890_v59  ;;  %1122 = vmatmul.f32.vlgmr.msra.gmra.mxu1 %v964_v20 }
 0x284   :  { %v936_v14 = vadd.f32 %v935_v13, %v913_v21 }
 0x286   :  { %v959_v23 = vadd.f32 %v958_v22, %v936_v14 }
 0x288   :  { %v968_v29 = vmax.f32 %v959_v23, 0.0 }
 0x28a   :  { %1125 = vmatmul.f32.gmra.mxu1 %v968_v29 }
 0x2ba   :  { %v1054_v24 = vpop.f32.mrf.mxu2 }
 0x2bb   :  { %v1055_v26 = vadd.f32 %v1169_v39, %v1054_v24 }
 0x2c8   :  { %v1057_v31 = vpop.f32.mrf.mxu2 }
 0x2c9   :  { %v1058_v35 = vadd.f32 %v1169_v39, %v1057_v31 }
 0x2d2   :  { %v1077_v30 = vpop.f32.mrf.mxu3 }
 0x2d3   :  { %v1078_v27 = vadd.f32 %v1077_v30, %v1055_v26 }
 0x2dc   :  { %v1080_v34 = vpop.f32.mrf.mxu3 }
 0x2dd   :  { %v1081_v37 = vadd.f32 %v1080_v34, %v1058_v35 }
 0x2e2   :  { %v1100_v25 = vpop.f32.mrf.mxu0 }
 0x2e3   :  { %v1101_v28 = vadd.f32 %v1100_v25, %v1078_v27 }
 0x2ec   :  { %v1103_v36 = vpop.f32.mrf.mxu0 }
 0x2ed   :  { %v1104_v38 = vadd.f32 %v1103_v36, %v1081_v37 }
 0x2ff   :  { %v1123_v32 = vpop.f32.mrf.mxu1 }
 0x300   :  { %v1124_v33 = vadd.f32 %v1123_v32, %v1101_v28 }
 0x302   :  { %1129 = vst [vmem:[%s1507_s11] sm:$0xff] %v1124_v33 }
 0x307   :  { %v1126_v40 = vpop.f32.mrf.mxu1 }
 0x308   :  { %v1127_v41 = vadd.f32 %v1126_v40, %v1104_v38 }
 0x30a   :  { %1130 = vst [vmem:[%s1507_s11 + $0x8] sm:$0xff] %v1127_v41 }
 0x30b   :  { %1135 = vsyncpa [#allocation3], 1 }
 0x30c   :  { %1136 = vsyncpa [#allocation5], 1 }
 0x30d   :  { %1137 = vsyncpa [#allocation8], 1 }

</bundles_post_ra>
